<compile_context>
chip_gen: v5e
topology: v5e:2x2
jax: 0.10.0
libtpu: 0.0.40
codegen_flags: <defaults>
</compile_context>

<pallas_src>
import functools

import jax
import jax.numpy as jnp
import numpy as np
from jax.experimental import pallas as pl
from jax.experimental.pallas import tpu as pltpu


def _round_up(a, b):
    return ((a + b - 1) // b) * b


def _gru_encoder_kernel(
    x_ref,        # (T_BLK, N_pad, D)      current time block
    w_ih_ref,     # (D, 3*H_pad)           fused input weights  [r | z | n]
    b_ih_ref,     # (1, 3*H_pad)           fused input biases   [b_r | b_z | b_in]
    w_hh_ref,     # (H_pad, 3*H_pad)       fused hidden weights [r | z | n]
    b_hh_ref,     # (1, 3*H_pad)           fused hidden biases  [0 | 0 | b_hn]
    w_head_ref,   # (H_pad, G_pad)         fused fc_mu | fc_var weights
    b_head_ref,   # (1, G_pad)             fused fc_mu | fc_var biases
    out_ref,      # (T_BLK, N_pad, G_pad)  mu | var slab
    h_scratch,    # VMEM (N_pad, H_pad)    carried hidden state
):
    tb = pl.program_id(0)
    T_BLK, N_pad, _ = x_ref.shape
    H_pad = h_scratch.shape[-1]

    @pl.when(tb == 0)
    def _():
        # GRU initial hidden state is zeros (self._hidden_state in __init__).
        h_scratch[...] = jnp.zeros_like(h_scratch)

    # ---- Phase 1: input projections for the whole block, hoisted off the
    # serial recurrence path. One wide MXU GEMM instead of T_BLK slivers.
    x_blk = x_ref[...].reshape(T_BLK * N_pad, x_ref.shape[-1])
    gx = (
        jnp.dot(x_blk, w_ih_ref[...], preferred_element_type=jnp.float32)
        + b_ih_ref[...]
    )                                                    # (T_BLK*N_pad, 3*H_pad)

    # Hoist grid-invariant weight/bias reads out of the unrolled time loop.
    w_hh = w_hh_ref[...]
    b_hh = b_hh_ref[...]

    # ---- Phase 2: serial GRU recurrence. A single fused (N,H)@(H,3H) dot per
    # step; gate slices are lane-aligned because H_pad % 128 == 0.
    # T_BLK is a compile-time constant -> statically unrolled for LLO.
    h = h_scratch[...]
    hs = []
    for t in range(T_BLK):
        gx_t = gx[t * N_pad:(t + 1) * N_pad]             # (N_pad, 3*H_pad)
        gh = jnp.dot(h, w_hh, preferred_element_type=jnp.float32) + b_hh
        r = jax.nn.sigmoid(gx_t[:, 0:H_pad] + gh[:, 0:H_pad])
        z = jax.nn.sigmoid(gx_t[:, H_pad:2 * H_pad] + gh[:, H_pad:2 * H_pad])
        n = jnp.tanh(gx_t[:, 2 * H_pad:3 * H_pad]
                     + r * gh[:, 2 * H_pad:3 * H_pad])
        h = (1.0 - z) * n + z * h
        hs.append(h)
    h_scratch[...] = h

    # ---- Phase 3: fused mu|var head as one batched GEMM over the block,
    # written as a single lane-dense slab (G_pad % 128 == 0).
    h_all = jnp.concatenate(hs, axis=0)                  # (T_BLK*N_pad, H_pad)
    out = (
        jnp.dot(h_all, w_head_ref[...], preferred_element_type=jnp.float32)
        + b_head_ref[...]
    )
    out_ref[...] = out.reshape(T_BLK, N_pad, out.shape[-1])


def _fuse_and_pad_params(params, H, O, H_pad, G_pad):
    """Fuse per-gate / per-head weights into wide, lane-padded matrices.

    Gate g occupies columns [g*H_pad, g*H_pad + H) (order r, z, n); padded
    lanes are zero so they contribute nothing and padded hidden units stay 0.
    Head: columns [0,O) = fc_mu, [O,2O) = fc_var, rest zero.
    (In a real model this would be done once at parameter load time.)
    """
    D = params["w_ir"].shape[0]
    f32 = jnp.float32

    w_ih = jnp.zeros((D, 3 * H_pad), f32)
    w_ih = w_ih.at[:, 0 * H_pad:0 * H_pad + H].set(params["w_ir"])
    w_ih = w_ih.at[:, 1 * H_pad:1 * H_pad + H].set(params["w_iz"])
    w_ih = w_ih.at[:, 2 * H_pad:2 * H_pad + H].set(params["w_in"])

    b_ih = jnp.zeros((1, 3 * H_pad), f32)
    b_ih = b_ih.at[:, 0 * H_pad:0 * H_pad + H].set(params["b_r"])
    b_ih = b_ih.at[:, 1 * H_pad:1 * H_pad + H].set(params["b_z"])
    b_ih = b_ih.at[:, 2 * H_pad:2 * H_pad + H].set(params["b_in"])

    w_hh = jnp.zeros((H_pad, 3 * H_pad), f32)
    w_hh = w_hh.at[:H, 0 * H_pad:0 * H_pad + H].set(params["w_hr"])
    w_hh = w_hh.at[:H, 1 * H_pad:1 * H_pad + H].set(params["w_hz"])
    w_hh = w_hh.at[:H, 2 * H_pad:2 * H_pad + H].set(params["w_hn"])

    b_hh = jnp.zeros((1, 3 * H_pad), f32)
    b_hh = b_hh.at[:, 2 * H_pad:2 * H_pad + H].set(params["b_hn"])

    w_head = jnp.zeros((H_pad, G_pad), f32)
    w_head = w_head.at[:H, 0:O].set(params["w_mu"])
    w_head = w_head.at[:H, O:2 * O].set(params["w_var"])

    b_head = jnp.zeros((1, G_pad), f32)
    b_head = b_head.at[:, 0:O].set(params["b_mu"])
    b_head = b_head.at[:, O:2 * O].set(params["b_var"])

    return w_ih, b_ih, w_hh, b_hh, w_head, b_head


@functools.partial(jax.jit, static_argnames=("time_block",))
def gru_recurrent_encoder_forward(x, params, *, time_block=8):
    """x: (S, N, D) float32, time-major. Returns (latent_mean, latent_var),
    each (S, N, O)."""
    S, N, D = x.shape
    H = params["w_hr"].shape[0]
    O = params["w_mu"].shape[1]

    N_pad = _round_up(N, 8)        # sublane tile
    H_pad = _round_up(H, 128)      # lane tile -> lane-aligned gate slices
    G_pad = _round_up(2 * O, 128)  # lane-dense fused mu|var output slab
    T_BLK = min(time_block, S)
    S_pad = _round_up(S, T_BLK)
    num_blocks = S_pad // T_BLK

    # Wrapper-side layout plumbing (pad x; fuse+pad weights).
    x_p = jnp.pad(x.astype(jnp.float32),
                  ((0, S_pad - S), (0, N_pad - N), (0, 0)))
    w_ih, b_ih, w_hh, b_hh, w_head, b_head = _fuse_and_pad_params(
        params, H, O, H_pad, G_pad)
    # TODO(synk): layers_before_gru / layers_after_gru are empty by default in
    # the module; non-empty configs would add fused Linear+ReLU stages here.

    # Weights are grid-invariant (constant index_map), so the pipeline does
    # not re-DMA them between grid steps.
    invariant = lambda shape: pl.BlockSpec(shape, lambda tb: (0,) * len(shape))

    grid_spec = pltpu.PrefetchScalarGridSpec(
        num_scalar_prefetch=0,
        grid=(num_blocks,),
        in_specs=[
            pl.BlockSpec((T_BLK, N_pad, D), lambda tb: (tb, 0, 0)),   # x block
            invariant((D, 3 * H_pad)),
            invariant((1, 3 * H_pad)),
            invariant((H_pad, 3 * H_pad)),
            invariant((1, 3 * H_pad)),
            invariant((H_pad, G_pad)),
            invariant((1, G_pad)),
        ],
        out_specs=pl.BlockSpec((T_BLK, N_pad, G_pad), lambda tb: (tb, 0, 0)),
        scratch_shapes=[pltpu.VMEM((N_pad, H_pad), jnp.float32)],
    )

    flops = int(2 * S_pad * N_pad
                * (D * 3 * H_pad + H_pad * 3 * H_pad + H_pad * G_pad))
    transcendentals = int(3 * S_pad * N_pad * H_pad)
    bytes_accessed = int(4 * (x_p.size + w_ih.size + b_ih.size + w_hh.size
                              + b_hh.size + w_head.size + b_head.size
                              + S_pad * N_pad * G_pad))

    out = pl.pallas_call(
        _gru_encoder_kernel,
        grid_spec=grid_spec,
        out_shape=jax.ShapeDtypeStruct((S_pad, N_pad, G_pad), jnp.float32),
        compiler_params=pltpu.CompilerParams(
            # Recurrence over time is strictly sequential.
            dimension_semantics=("arbitrary",),
        ),
        cost_estimate=pl.CostEstimate(
            flops=flops,
            transcendentals=transcendentals,
            bytes_accessed=bytes_accessed,
        ),
    )(x_p, w_ih, b_ih, w_hh, b_hh, w_head, b_head)

    latent_mean = out[:S, :N, 0:O]
    latent_var = out[:S, :N, O:2 * O]
    return latent_mean, latent_var


def reference_forward(x, params):
    """Pure-JAX reference of the same forward pass (lax.scan GRU)."""
    S, N, D = x.shape
    H = params["w_hr"].shape[0]

    def step(h, x_t):
        r = jax.nn.sigmoid(x_t @ params["w_ir"] + h @ params["w_hr"] + params["b_r"])
        z = jax.nn.sigmoid(x_t @ params["w_iz"] + h @ params["w_hz"] + params["b_z"])
        n = jnp.tanh(x_t @ params["w_in"] + params["b_in"]
                     + r * (h @ params["w_hn"] + params["b_hn"]))
        h_new = (1.0 - z) * n + z * h
        mu = h_new @ params["w_mu"] + params["b_mu"]
        var = h_new @ params["w_var"] + params["b_var"]
        return h_new, (mu, var)

    h0 = jnp.zeros((N, H), jnp.float32)
    _, (mu, var) = jax.lax.scan(step, h0, x)
    return mu, var


def make_params(key, input_dim, hidden_size, output_dim):
    """Deterministic synthetic parameters matching the nn.GRU / nn.Linear shapes.

    nn.GRU weight_ih_l0: (3H, D) in r,z,n order; weight_hh_l0: (3H, H);
    bias_ih_l0, bias_hh_l0: (3H,). Stored pre-transposed / pre-split, with
    b_r = b_ir + b_hr and b_z = b_iz + b_hz folded (equivalent math); b_in and
    b_hn kept separate because of the reset-gate multiply.
    """
    ks = jax.random.split(key, 12)
    D, H, O = input_dim, hidden_size, output_dim
    s_ih = 1.0 / np.sqrt(D)
    s_hh = 1.0 / np.sqrt(H)

    def nrm(k, shape, scale):
        return (scale * jax.random.normal(k, shape)).astype(jnp.float32)

    params = {
        "w_ir": nrm(ks[0], (D, H), s_ih),
        "w_iz": nrm(ks[1], (D, H), s_ih),
        "w_in": nrm(ks[2], (D, H), s_ih),
        "w_hr": nrm(ks[3], (H, H), s_hh),
        "w_hz": nrm(ks[4], (H, H), s_hh),
        "w_hn": nrm(ks[5], (H, H), s_hh),
        "b_r": nrm(ks[6], (1, H), s_hh),
        "b_z": nrm(ks[7], (1, H), s_hh),
        "b_in": nrm(ks[8], (1, H), s_hh),
        "b_hn": nrm(ks[9], (1, H), s_hh),
        "w_mu": nrm(ks[10], (H, O), np.sqrt(2.0 / (H + O))),
        "w_var": nrm(ks[11], (H, O), np.sqrt(2.0 / (H + O))),
        "b_mu": jnp.zeros((1, O), jnp.float32),
        "b_var": jnp.zeros((1, O), jnp.float32),
    }
    return params


if __name__ == "__main__":
    # Small shapes consistent with the module: seq=8, batch(num_tasks)=2,
    # input_dim=16, hidden_size=32, output_dims=16 -> output_dim=8.
    S, N, D, H = 8, 2, 16, 32
    OUTPUT_DIMS = 16
    O = OUTPUT_DIMS // 2

    key = jax.random.PRNGKey(0)
    kx, kp = jax.random.split(key)
    x = jax.random.normal(kx, (S, N, D), dtype=jnp.float32)  # (S, N, D), time-major
    params = make_params(kp, D, H, O)

    latent_mean, latent_var = gru_recurrent_encoder_forward(x, params)
    latent_mean = jax.block_until_ready(latent_mean)
    latent_var = jax.block_until_ready(latent_var)

    ref_mean, ref_var = reference_forward(x, params)
    np.testing.assert_allclose(np.asarray(latent_mean), np.asarray(ref_mean),
                               rtol=1e-5, atol=1e-5)
    np.testing.assert_allclose(np.asarray(latent_var), np.asarray(ref_var),
                               rtol=1e-5, atol=1e-5)

    print("KERNEL_OK")
</pallas_src>

<mosaic_0001>
module attributes {stable_mosaic.version = 11 : i64} {
  func.func @_gru_encoder_kernel(%arg0: i32, %arg1: memref<8x8x16xf32, #tpu.memory_space<vmem>>, %arg2: memref<16x384xf32, #tpu.memory_space<vmem>>, %arg3: memref<1x384xf32, #tpu.memory_space<vmem>>, %arg4: memref<128x384xf32, #tpu.memory_space<vmem>>, %arg5: memref<1x384xf32, #tpu.memory_space<vmem>>, %arg6: memref<128x128xf32, #tpu.memory_space<vmem>>, %arg7: memref<1x128xf32, #tpu.memory_space<vmem>>, %arg8: memref<8x8x128xf32, #tpu.memory_space<vmem>>, %arg9: memref<8x128xf32, #tpu.memory_space<vmem>>) attributes {dimension_semantics = [#tpu.dimension_semantics<arbitrary>], iteration_bounds = array<i64: 1>, scalar_prefetch = 0 : i64, scratch_operands = 1 : i64, tpu.core_type = #tpu.core_type<tc>, window_params = [{transform_indices = @transform_0, window_bounds = array<i64: 8, 8, 16>}, {pipeline_mode = #tpu.pipeline_mode<synchronous>, transform_indices = @transform_1, window_bounds = array<i64: 16, 384>}, {pipeline_mode = #tpu.pipeline_mode<synchronous>, transform_indices = @transform_2, window_bounds = array<i64: 1, 384>}, {pipeline_mode = #tpu.pipeline_mode<synchronous>, transform_indices = @transform_3, window_bounds = array<i64: 128, 384>}, {pipeline_mode = #tpu.pipeline_mode<synchronous>, transform_indices = @transform_4, window_bounds = array<i64: 1, 384>}, {pipeline_mode = #tpu.pipeline_mode<synchronous>, transform_indices = @transform_5, window_bounds = array<i64: 128, 128>}, {pipeline_mode = #tpu.pipeline_mode<synchronous>, transform_indices = @transform_6, window_bounds = array<i64: 1, 128>}, {transform_indices = @transform_7, window_bounds = array<i64: 8, 8, 128>}]} {
    %c0_i32 = arith.constant 0 : i32
    %0 = arith.cmpi eq, %arg0, %c0_i32 : i32
    %1 = arith.extui %0 : i1 to i32
    %c0_i32_0 = arith.constant 0 : i32
    %2 = arith.cmpi ne, %1, %c0_i32_0 : i32
    scf.if %2 {
      %cst_55 = arith.constant 0.000000e+00 : f32
      %262 = vector.broadcast %cst_55 : f32 to vector<8x128xf32>
      %c0_56 = arith.constant 0 : index
      %c0_57 = arith.constant 0 : index
      %263 = vector.load %arg9[%c0_56, %c0_57] : memref<8x128xf32, #tpu.memory_space<vmem>>, vector<8x128xf32>
      tpu.vector_store %arg9[%c0_56, %c0_57], %262 {strides = array<i32>} : memref<8x128xf32, #tpu.memory_space<vmem>>, vector<8x128xf32>,
    } else {
    }
    %c0 = arith.constant 0 : index
    %c0_1 = arith.constant 0 : index
    %c0_2 = arith.constant 0 : index
    %3 = vector.load %arg1[%c0, %c0_1, %c0_2] : memref<8x8x16xf32, #tpu.memory_space<vmem>>, vector<8x8x16xf32>
    %4 = vector.shape_cast %3 : vector<8x8x16xf32> to vector<64x16xf32>
    %c0_3 = arith.constant 0 : index
    %c0_4 = arith.constant 0 : index
    %5 = vector.load %arg2[%c0_3, %c0_4] : memref<16x384xf32, #tpu.memory_space<vmem>>, vector<16x384xf32>
    %cst = arith.constant dense<0.000000e+00> : vector<64x384xf32>
    %6 = tpu.matmul %4, %5, %cst {dimension_numbers = #tpu.dot_dimension_numbers<[1], [0], [0], [1], [0, 0, 1, 1], [], []>} : vector<64x16xf32>, vector<16x384xf32>, vector<64x384xf32> -> vector<64x384xf32>
    %c0_5 = arith.constant 0 : index
    %c0_6 = arith.constant 0 : index
    %7 = vector.load %arg3[%c0_5, %c0_6] : memref<1x384xf32, #tpu.memory_space<vmem>>, vector<1x384xf32>
    %8 = vector.broadcast %7 : vector<1x384xf32> to vector<64x384xf32>
    %9 = arith.addf %6, %8 : vector<64x384xf32>
    %c0_7 = arith.constant 0 : index
    %c0_8 = arith.constant 0 : index
    %10 = vector.load %arg4[%c0_7, %c0_8] : memref<128x384xf32, #tpu.memory_space<vmem>>, vector<128x384xf32>
    %c0_9 = arith.constant 0 : index
    %c0_10 = arith.constant 0 : index
    %11 = vector.load %arg5[%c0_9, %c0_10] : memref<1x384xf32, #tpu.memory_space<vmem>>, vector<1x384xf32>
    %c0_11 = arith.constant 0 : index
    %c0_12 = arith.constant 0 : index
    %12 = vector.load %arg9[%c0_11, %c0_12] : memref<8x128xf32, #tpu.memory_space<vmem>>, vector<8x128xf32>
    %13 = vector.extract_strided_slice %9 {offsets = [0, 0], sizes = [8, 384], strides = [1, 1]} : vector<64x384xf32> to vector<8x384xf32>
    %cst_13 = arith.constant dense<0.000000e+00> : vector<8x384xf32>
    %14 = tpu.matmul %12, %10, %cst_13 {dimension_numbers = #tpu.dot_dimension_numbers<[1], [0], [0], [1], [0, 0, 1, 1], [], []>} : vector<8x128xf32>, vector<128x384xf32>, vector<8x384xf32> -> vector<8x384xf32>
    %15 = vector.broadcast %11 : vector<1x384xf32> to vector<8x384xf32>
    %16 = arith.addf %14, %15 : vector<8x384xf32>
    %17 = vector.extract_strided_slice %13 {offsets = [0, 0], sizes = [8, 128], strides = [1, 1]} : vector<8x384xf32> to vector<8x128xf32>
    %18 = vector.extract_strided_slice %16 {offsets = [0, 0], sizes = [8, 128], strides = [1, 1]} : vector<8x384xf32> to vector<8x128xf32>
    %19 = arith.addf %17, %18 : vector<8x128xf32>
    %20 = arith.negf %19 : vector<8x128xf32>
    %21 = math.exp %20 : vector<8x128xf32>
    %cst_14 = arith.constant 1.000000e+00 : f32
    %22 = vector.broadcast %cst_14 : f32 to vector<8x128xf32>
    %23 = arith.addf %22, %21 : vector<8x128xf32>
    %24 = arith.divf %22, %23 : vector<8x128xf32>
    %25 = vector.extract_strided_slice %13 {offsets = [0, 128], sizes = [8, 128], strides = [1, 1]} : vector<8x384xf32> to vector<8x128xf32>
    %26 = vector.extract_strided_slice %16 {offsets = [0, 128], sizes = [8, 128], strides = [1, 1]} : vector<8x384xf32> to vector<8x128xf32>
    %27 = arith.addf %25, %26 : vector<8x128xf32>
    %28 = arith.negf %27 : vector<8x128xf32>
    %29 = math.exp %28 : vector<8x128xf32>
    %cst_15 = arith.constant 1.000000e+00 : f32
    %30 = vector.broadcast %cst_15 : f32 to vector<8x128xf32>
    %31 = arith.addf %30, %29 : vector<8x128xf32>
    %32 = arith.divf %30, %31 : vector<8x128xf32>
    %33 = vector.extract_strided_slice %13 {offsets = [0, 256], sizes = [8, 128], strides = [1, 1]} : vector<8x384xf32> to vector<8x128xf32>
    %34 = vector.extract_strided_slice %16 {offsets = [0, 256], sizes = [8, 128], strides = [1, 1]} : vector<8x384xf32> to vector<8x128xf32>
    %35 = arith.mulf %24, %34 : vector<8x128xf32>
    %36 = arith.addf %33, %35 : vector<8x128xf32>
    %37 = math.tanh %36 : vector<8x128xf32>
    %cst_16 = arith.constant 1.000000e+00 : f32
    %38 = vector.broadcast %cst_16 : f32 to vector<8x128xf32>
    %39 = arith.subf %38, %32 : vector<8x128xf32>
    %40 = arith.mulf %39, %37 : vector<8x128xf32>
    %41 = arith.mulf %32, %12 : vector<8x128xf32>
    %42 = arith.addf %40, %41 : vector<8x128xf32>
    %43 = vector.extract_strided_slice %9 {offsets = [8, 0], sizes = [8, 384], strides = [1, 1]} : vector<64x384xf32> to vector<8x384xf32>
    %cst_17 = arith.constant dense<0.000000e+00> : vector<8x384xf32>
    %44 = tpu.matmul %42, %10, %cst_17 {dimension_numbers = #tpu.dot_dimension_numbers<[1], [0], [0], [1], [0, 0, 1, 1], [], []>} : vector<8x128xf32>, vector<128x384xf32>, vector<8x384xf32> -> vector<8x384xf32>
    %45 = vector.broadcast %11 : vector<1x384xf32> to vector<8x384xf32>
    %46 = arith.addf %44, %45 : vector<8x384xf32>
    %47 = vector.extract_strided_slice %43 {offsets = [0, 0], sizes = [8, 128], strides = [1, 1]} : vector<8x384xf32> to vector<8x128xf32>
    %48 = vector.extract_strided_slice %46 {offsets = [0, 0], sizes = [8, 128], strides = [1, 1]} : vector<8x384xf32> to vector<8x128xf32>
    %49 = arith.addf %47, %48 : vector<8x128xf32>
    %50 = arith.negf %49 : vector<8x128xf32>
    %51 = math.exp %50 : vector<8x128xf32>
    %cst_18 = arith.constant 1.000000e+00 : f32
    %52 = vector.broadcast %cst_18 : f32 to vector<8x128xf32>
    %53 = arith.addf %52, %51 : vector<8x128xf32>
    %54 = arith.divf %52, %53 : vector<8x128xf32>
    %55 = vector.extract_strided_slice %43 {offsets = [0, 128], sizes = [8, 128], strides = [1, 1]} : vector<8x384xf32> to vector<8x128xf32>
    %56 = vector.extract_strided_slice %46 {offsets = [0, 128], sizes = [8, 128], strides = [1, 1]} : vector<8x384xf32> to vector<8x128xf32>
    %57 = arith.addf %55, %56 : vector<8x128xf32>
    %58 = arith.negf %57 : vector<8x128xf32>
    %59 = math.exp %58 : vector<8x128xf32>
    %cst_19 = arith.constant 1.000000e+00 : f32
    %60 = vector.broadcast %cst_19 : f32 to vector<8x128xf32>
    %61 = arith.addf %60, %59 : vector<8x128xf32>
    %62 = arith.divf %60, %61 : vector<8x128xf32>
    %63 = vector.extract_strided_slice %43 {offsets = [0, 256], sizes = [8, 128], strides = [1, 1]} : vector<8x384xf32> to vector<8x128xf32>
    %64 = vector.extract_strided_slice %46 {offsets = [0, 256], sizes = [8, 128], strides = [1, 1]} : vector<8x384xf32> to vector<8x128xf32>
    %65 = arith.mulf %54, %64 : vector<8x128xf32>
    %66 = arith.addf %63, %65 : vector<8x128xf32>
    %67 = math.tanh %66 : vector<8x128xf32>
    %cst_20 = arith.constant 1.000000e+00 : f32
    %68 = vector.broadcast %cst_20 : f32 to vector<8x128xf32>
    %69 = arith.subf %68, %62 : vector<8x128xf32>
    %70 = arith.mulf %69, %67 : vector<8x128xf32>
    %71 = arith.mulf %62, %42 : vector<8x128xf32>
    %72 = arith.addf %70, %71 : vector<8x128xf32>
    %73 = vector.extract_strided_slice %9 {offsets = [16, 0], sizes = [8, 384], strides = [1, 1]} : vector<64x384xf32> to vector<8x384xf32>
    %cst_21 = arith.constant dense<0.000000e+00> : vector<8x384xf32>
    %74 = tpu.matmul %72, %10, %cst_21 {dimension_numbers = #tpu.dot_dimension_numbers<[1], [0], [0], [1], [0, 0, 1, 1], [], []>} : vector<8x128xf32>, vector<128x384xf32>, vector<8x384xf32> -> vector<8x384xf32>
    %75 = vector.broadcast %11 : vector<1x384xf32> to vector<8x384xf32>
    %76 = arith.addf %74, %75 : vector<8x384xf32>
    %77 = vector.extract_strided_slice %73 {offsets = [0, 0], sizes = [8, 128], strides = [1, 1]} : vector<8x384xf32> to vector<8x128xf32>
    %78 = vector.extract_strided_slice %76 {offsets = [0, 0], sizes = [8, 128], strides = [1, 1]} : vector<8x384xf32> to vector<8x128xf32>
    %79 = arith.addf %77, %78 : vector<8x128xf32>
    %80 = arith.negf %79 : vector<8x128xf32>
    %81 = math.exp %80 : vector<8x128xf32>
    %cst_22 = arith.constant 1.000000e+00 : f32
    %82 = vector.broadcast %cst_22 : f32 to vector<8x128xf32>
    %83 = arith.addf %82, %81 : vector<8x128xf32>
    %84 = arith.divf %82, %83 : vector<8x128xf32>
    %85 = vector.extract_strided_slice %73 {offsets = [0, 128], sizes = [8, 128], strides = [1, 1]} : vector<8x384xf32> to vector<8x128xf32>
    %86 = vector.extract_strided_slice %76 {offsets = [0, 128], sizes = [8, 128], strides = [1, 1]} : vector<8x384xf32> to vector<8x128xf32>
    %87 = arith.addf %85, %86 : vector<8x128xf32>
    %88 = arith.negf %87 : vector<8x128xf32>
    %89 = math.exp %88 : vector<8x128xf32>
    %cst_23 = arith.constant 1.000000e+00 : f32
    %90 = vector.broadcast %cst_23 : f32 to vector<8x128xf32>
    %91 = arith.addf %90, %89 : vector<8x128xf32>
    %92 = arith.divf %90, %91 : vector<8x128xf32>
    %93 = vector.extract_strided_slice %73 {offsets = [0, 256], sizes = [8, 128], strides = [1, 1]} : vector<8x384xf32> to vector<8x128xf32>
    %94 = vector.extract_strided_slice %76 {offsets = [0, 256], sizes = [8, 128], strides = [1, 1]} : vector<8x384xf32> to vector<8x128xf32>
    %95 = arith.mulf %84, %94 : vector<8x128xf32>
    %96 = arith.addf %93, %95 : vector<8x128xf32>
    %97 = math.tanh %96 : vector<8x128xf32>
    %cst_24 = arith.constant 1.000000e+00 : f32
    %98 = vector.broadcast %cst_24 : f32 to vector<8x128xf32>
    %99 = arith.subf %98, %92 : vector<8x128xf32>
    %100 = arith.mulf %99, %97 : vector<8x128xf32>
    %101 = arith.mulf %92, %72 : vector<8x128xf32>
    %102 = arith.addf %100, %101 : vector<8x128xf32>
    %103 = vector.extract_strided_slice %9 {offsets = [24, 0], sizes = [8, 384], strides = [1, 1]} : vector<64x384xf32> to vector<8x384xf32>
    %cst_25 = arith.constant dense<0.000000e+00> : vector<8x384xf32>
    %104 = tpu.matmul %102, %10, %cst_25 {dimension_numbers = #tpu.dot_dimension_numbers<[1], [0], [0], [1], [0, 0, 1, 1], [], []>} : vector<8x128xf32>, vector<128x384xf32>, vector<8x384xf32> -> vector<8x384xf32>
    %105 = vector.broadcast %11 : vector<1x384xf32> to vector<8x384xf32>
    %106 = arith.addf %104, %105 : vector<8x384xf32>
    %107 = vector.extract_strided_slice %103 {offsets = [0, 0], sizes = [8, 128], strides = [1, 1]} : vector<8x384xf32> to vector<8x128xf32>
    %108 = vector.extract_strided_slice %106 {offsets = [0, 0], sizes = [8, 128], strides = [1, 1]} : vector<8x384xf32> to vector<8x128xf32>
    %109 = arith.addf %107, %108 : vector<8x128xf32>
    %110 = arith.negf %109 : vector<8x128xf32>
    %111 = math.exp %110 : vector<8x128xf32>
    %cst_26 = arith.constant 1.000000e+00 : f32
    %112 = vector.broadcast %cst_26 : f32 to vector<8x128xf32>
    %113 = arith.addf %112, %111 : vector<8x128xf32>
    %114 = arith.divf %112, %113 : vector<8x128xf32>
    %115 = vector.extract_strided_slice %103 {offsets = [0, 128], sizes = [8, 128], strides = [1, 1]} : vector<8x384xf32> to vector<8x128xf32>
    %116 = vector.extract_strided_slice %106 {offsets = [0, 128], sizes = [8, 128], strides = [1, 1]} : vector<8x384xf32> to vector<8x128xf32>
    %117 = arith.addf %115, %116 : vector<8x128xf32>
    %118 = arith.negf %117 : vector<8x128xf32>
    %119 = math.exp %118 : vector<8x128xf32>
    %cst_27 = arith.constant 1.000000e+00 : f32
    %120 = vector.broadcast %cst_27 : f32 to vector<8x128xf32>
    %121 = arith.addf %120, %119 : vector<8x128xf32>
    %122 = arith.divf %120, %121 : vector<8x128xf32>
    %123 = vector.extract_strided_slice %103 {offsets = [0, 256], sizes = [8, 128], strides = [1, 1]} : vector<8x384xf32> to vector<8x128xf32>
    %124 = vector.extract_strided_slice %106 {offsets = [0, 256], sizes = [8, 128], strides = [1, 1]} : vector<8x384xf32> to vector<8x128xf32>
    %125 = arith.mulf %114, %124 : vector<8x128xf32>
    %126 = arith.addf %123, %125 : vector<8x128xf32>
    %127 = math.tanh %126 : vector<8x128xf32>
    %cst_28 = arith.constant 1.000000e+00 : f32
    %128 = vector.broadcast %cst_28 : f32 to vector<8x128xf32>
    %129 = arith.subf %128, %122 : vector<8x128xf32>
    %130 = arith.mulf %129, %127 : vector<8x128xf32>
    %131 = arith.mulf %122, %102 : vector<8x128xf32>
    %132 = arith.addf %130, %131 : vector<8x128xf32>
    %133 = vector.extract_strided_slice %9 {offsets = [32, 0], sizes = [8, 384], strides = [1, 1]} : vector<64x384xf32> to vector<8x384xf32>
    %cst_29 = arith.constant dense<0.000000e+00> : vector<8x384xf32>
    %134 = tpu.matmul %132, %10, %cst_29 {dimension_numbers = #tpu.dot_dimension_numbers<[1], [0], [0], [1], [0, 0, 1, 1], [], []>} : vector<8x128xf32>, vector<128x384xf32>, vector<8x384xf32> -> vector<8x384xf32>
    %135 = vector.broadcast %11 : vector<1x384xf32> to vector<8x384xf32>
    %136 = arith.addf %134, %135 : vector<8x384xf32>
    %137 = vector.extract_strided_slice %133 {offsets = [0, 0], sizes = [8, 128], strides = [1, 1]} : vector<8x384xf32> to vector<8x128xf32>
    %138 = vector.extract_strided_slice %136 {offsets = [0, 0], sizes = [8, 128], strides = [1, 1]} : vector<8x384xf32> to vector<8x128xf32>
    %139 = arith.addf %137, %138 : vector<8x128xf32>
    %140 = arith.negf %139 : vector<8x128xf32>
    %141 = math.exp %140 : vector<8x128xf32>
    %cst_30 = arith.constant 1.000000e+00 : f32
    %142 = vector.broadcast %cst_30 : f32 to vector<8x128xf32>
    %143 = arith.addf %142, %141 : vector<8x128xf32>
    %144 = arith.divf %142, %143 : vector<8x128xf32>
    %145 = vector.extract_strided_slice %133 {offsets = [0, 128], sizes = [8, 128], strides = [1, 1]} : vector<8x384xf32> to vector<8x128xf32>
    %146 = vector.extract_strided_slice %136 {offsets = [0, 128], sizes = [8, 128], strides = [1, 1]} : vector<8x384xf32> to vector<8x128xf32>
    %147 = arith.addf %145, %146 : vector<8x128xf32>
    %148 = arith.negf %147 : vector<8x128xf32>
    %149 = math.exp %148 : vector<8x128xf32>
    %cst_31 = arith.constant 1.000000e+00 : f32
    %150 = vector.broadcast %cst_31 : f32 to vector<8x128xf32>
    %151 = arith.addf %150, %149 : vector<8x128xf32>
    %152 = arith.divf %150, %151 : vector<8x128xf32>
    %153 = vector.extract_strided_slice %133 {offsets = [0, 256], sizes = [8, 128], strides = [1, 1]} : vector<8x384xf32> to vector<8x128xf32>
    %154 = vector.extract_strided_slice %136 {offsets = [0, 256], sizes = [8, 128], strides = [1, 1]} : vector<8x384xf32> to vector<8x128xf32>
    %155 = arith.mulf %144, %154 : vector<8x128xf32>
    %156 = arith.addf %153, %155 : vector<8x128xf32>
    %157 = math.tanh %156 : vector<8x128xf32>
    %cst_32 = arith.constant 1.000000e+00 : f32
    %158 = vector.broadcast %cst_32 : f32 to vector<8x128xf32>
    %159 = arith.subf %158, %152 : vector<8x128xf32>
    %160 = arith.mulf %159, %157 : vector<8x128xf32>
    %161 = arith.mulf %152, %132 : vector<8x128xf32>
    %162 = arith.addf %160, %161 : vector<8x128xf32>
    %163 = vector.extract_strided_slice %9 {offsets = [40, 0], sizes = [8, 384], strides = [1, 1]} : vector<64x384xf32> to vector<8x384xf32>
    %cst_33 = arith.constant dense<0.000000e+00> : vector<8x384xf32>
    %164 = tpu.matmul %162, %10, %cst_33 {dimension_numbers = #tpu.dot_dimension_numbers<[1], [0], [0], [1], [0, 0, 1, 1], [], []>} : vector<8x128xf32>, vector<128x384xf32>, vector<8x384xf32> -> vector<8x384xf32>
    %165 = vector.broadcast %11 : vector<1x384xf32> to vector<8x384xf32>
    %166 = arith.addf %164, %165 : vector<8x384xf32>
    %167 = vector.extract_strided_slice %163 {offsets = [0, 0], sizes = [8, 128], strides = [1, 1]} : vector<8x384xf32> to vector<8x128xf32>
    %168 = vector.extract_strided_slice %166 {offsets = [0, 0], sizes = [8, 128], strides = [1, 1]} : vector<8x384xf32> to vector<8x128xf32>
    %169 = arith.addf %167, %168 : vector<8x128xf32>
    %170 = arith.negf %169 : vector<8x128xf32>
    %171 = math.exp %170 : vector<8x128xf32>
    %cst_34 = arith.constant 1.000000e+00 : f32
    %172 = vector.broadcast %cst_34 : f32 to vector<8x128xf32>
    %173 = arith.addf %172, %171 : vector<8x128xf32>
    %174 = arith.divf %172, %173 : vector<8x128xf32>
    %175 = vector.extract_strided_slice %163 {offsets = [0, 128], sizes = [8, 128], strides = [1, 1]} : vector<8x384xf32> to vector<8x128xf32>
    %176 = vector.extract_strided_slice %166 {offsets = [0, 128], sizes = [8, 128], strides = [1, 1]} : vector<8x384xf32> to vector<8x128xf32>
    %177 = arith.addf %175, %176 : vector<8x128xf32>
    %178 = arith.negf %177 : vector<8x128xf32>
    %179 = math.exp %178 : vector<8x128xf32>
    %cst_35 = arith.constant 1.000000e+00 : f32
    %180 = vector.broadcast %cst_35 : f32 to vector<8x128xf32>
    %181 = arith.addf %180, %179 : vector<8x128xf32>
    %182 = arith.divf %180, %181 : vector<8x128xf32>
    %183 = vector.extract_strided_slice %163 {offsets = [0, 256], sizes = [8, 128], strides = [1, 1]} : vector<8x384xf32> to vector<8x128xf32>
    %184 = vector.extract_strided_slice %166 {offsets = [0, 256], sizes = [8, 128], strides = [1, 1]} : vector<8x384xf32> to vector<8x128xf32>
    %185 = arith.mulf %174, %184 : vector<8x128xf32>
    %186 = arith.addf %183, %185 : vector<8x128xf32>
    %187 = math.tanh %186 : vector<8x128xf32>
    %cst_36 = arith.constant 1.000000e+00 : f32
    %188 = vector.broadcast %cst_36 : f32 to vector<8x128xf32>
    %189 = arith.subf %188, %182 : vector<8x128xf32>
    %190 = arith.mulf %189, %187 : vector<8x128xf32>
    %191 = arith.mulf %182, %162 : vector<8x128xf32>
    %192 = arith.addf %190, %191 : vector<8x128xf32>
    %193 = vector.extract_strided_slice %9 {offsets = [48, 0], sizes = [8, 384], strides = [1, 1]} : vector<64x384xf32> to vector<8x384xf32>
    %cst_37 = arith.constant dense<0.000000e+00> : vector<8x384xf32>
    %194 = tpu.matmul %192, %10, %cst_37 {dimension_numbers = #tpu.dot_dimension_numbers<[1], [0], [0], [1], [0, 0, 1, 1], [], []>} : vector<8x128xf32>, vector<128x384xf32>, vector<8x384xf32> -> vector<8x384xf32>
    %195 = vector.broadcast %11 : vector<1x384xf32> to vector<8x384xf32>
    %196 = arith.addf %194, %195 : vector<8x384xf32>
    %197 = vector.extract_strided_slice %193 {offsets = [0, 0], sizes = [8, 128], strides = [1, 1]} : vector<8x384xf32> to vector<8x128xf32>
    %198 = vector.extract_strided_slice %196 {offsets = [0, 0], sizes = [8, 128], strides = [1, 1]} : vector<8x384xf32> to vector<8x128xf32>
    %199 = arith.addf %197, %198 : vector<8x128xf32>
    %200 = arith.negf %199 : vector<8x128xf32>
    %201 = math.exp %200 : vector<8x128xf32>
    %cst_38 = arith.constant 1.000000e+00 : f32
    %202 = vector.broadcast %cst_38 : f32 to vector<8x128xf32>
    %203 = arith.addf %202, %201 : vector<8x128xf32>
    %204 = arith.divf %202, %203 : vector<8x128xf32>
    %205 = vector.extract_strided_slice %193 {offsets = [0, 128], sizes = [8, 128], strides = [1, 1]} : vector<8x384xf32> to vector<8x128xf32>
    %206 = vector.extract_strided_slice %196 {offsets = [0, 128], sizes = [8, 128], strides = [1, 1]} : vector<8x384xf32> to vector<8x128xf32>
    %207 = arith.addf %205, %206 : vector<8x128xf32>
    %208 = arith.negf %207 : vector<8x128xf32>
    %209 = math.exp %208 : vector<8x128xf32>
    %cst_39 = arith.constant 1.000000e+00 : f32
    %210 = vector.broadcast %cst_39 : f32 to vector<8x128xf32>
    %211 = arith.addf %210, %209 : vector<8x128xf32>
    %212 = arith.divf %210, %211 : vector<8x128xf32>
    %213 = vector.extract_strided_slice %193 {offsets = [0, 256], sizes = [8, 128], strides = [1, 1]} : vector<8x384xf32> to vector<8x128xf32>
    %214 = vector.extract_strided_slice %196 {offsets = [0, 256], sizes = [8, 128], strides = [1, 1]} : vector<8x384xf32> to vector<8x128xf32>
    %215 = arith.mulf %204, %214 : vector<8x128xf32>
    %216 = arith.addf %213, %215 : vector<8x128xf32>
    %217 = math.tanh %216 : vector<8x128xf32>
    %cst_40 = arith.constant 1.000000e+00 : f32
    %218 = vector.broadcast %cst_40 : f32 to vector<8x128xf32>
    %219 = arith.subf %218, %212 : vector<8x128xf32>
    %220 = arith.mulf %219, %217 : vector<8x128xf32>
    %221 = arith.mulf %212, %192 : vector<8x128xf32>
    %222 = arith.addf %220, %221 : vector<8x128xf32>
    %223 = vector.extract_strided_slice %9 {offsets = [56, 0], sizes = [8, 384], strides = [1, 1]} : vector<64x384xf32> to vector<8x384xf32>
    %cst_41 = arith.constant dense<0.000000e+00> : vector<8x384xf32>
    %224 = tpu.matmul %222, %10, %cst_41 {dimension_numbers = #tpu.dot_dimension_numbers<[1], [0], [0], [1], [0, 0, 1, 1], [], []>} : vector<8x128xf32>, vector<128x384xf32>, vector<8x384xf32> -> vector<8x384xf32>
    %225 = vector.broadcast %11 : vector<1x384xf32> to vector<8x384xf32>
    %226 = arith.addf %224, %225 : vector<8x384xf32>
    %227 = vector.extract_strided_slice %223 {offsets = [0, 0], sizes = [8, 128], strides = [1, 1]} : vector<8x384xf32> to vector<8x128xf32>
    %228 = vector.extract_strided_slice %226 {offsets = [0, 0], sizes = [8, 128], strides = [1, 1]} : vector<8x384xf32> to vector<8x128xf32>
    %229 = arith.addf %227, %228 : vector<8x128xf32>
    %230 = arith.negf %229 : vector<8x128xf32>
    %231 = math.exp %230 : vector<8x128xf32>
    %cst_42 = arith.constant 1.000000e+00 : f32
    %232 = vector.broadcast %cst_42 : f32 to vector<8x128xf32>
    %233 = arith.addf %232, %231 : vector<8x128xf32>
    %234 = arith.divf %232, %233 : vector<8x128xf32>
    %235 = vector.extract_strided_slice %223 {offsets = [0, 128], sizes = [8, 128], strides = [1, 1]} : vector<8x384xf32> to vector<8x128xf32>
    %236 = vector.extract_strided_slice %226 {offsets = [0, 128], sizes = [8, 128], strides = [1, 1]} : vector<8x384xf32> to vector<8x128xf32>
    %237 = arith.addf %235, %236 : vector<8x128xf32>
    %238 = arith.negf %237 : vector<8x128xf32>
    %239 = math.exp %238 : vector<8x128xf32>
    %cst_43 = arith.constant 1.000000e+00 : f32
    %240 = vector.broadcast %cst_43 : f32 to vector<8x128xf32>
    %241 = arith.addf %240, %239 : vector<8x128xf32>
    %242 = arith.divf %240, %241 : vector<8x128xf32>
    %243 = vector.extract_strided_slice %223 {offsets = [0, 256], sizes = [8, 128], strides = [1, 1]} : vector<8x384xf32> to vector<8x128xf32>
    %244 = vector.extract_strided_slice %226 {offsets = [0, 256], sizes = [8, 128], strides = [1, 1]} : vector<8x384xf32> to vector<8x128xf32>
    %245 = arith.mulf %234, %244 : vector<8x128xf32>
    %246 = arith.addf %243, %245 : vector<8x128xf32>
    %247 = math.tanh %246 : vector<8x128xf32>
    %cst_44 = arith.constant 1.000000e+00 : f32
    %248 = vector.broadcast %cst_44 : f32 to vector<8x128xf32>
    %249 = arith.subf %248, %242 : vector<8x128xf32>
    %250 = arith.mulf %249, %247 : vector<8x128xf32>
    %251 = arith.mulf %242, %222 : vector<8x128xf32>
    %252 = arith.addf %250, %251 : vector<8x128xf32>
    %c0_45 = arith.constant 0 : index
    %c0_46 = arith.constant 0 : index
    %253 = vector.load %arg9[%c0_45, %c0_46] : memref<8x128xf32, #tpu.memory_space<vmem>>, vector<8x128xf32>
    tpu.vector_store %arg9[%c0_45, %c0_46], %252 {strides = array<i32>} : memref<8x128xf32, #tpu.memory_space<vmem>>, vector<8x128xf32>,
    %254 = tpu.concatenate %42, %72, %102, %132, %162, %192, %222, %252 in 0 : vector<8x128xf32>, vector<8x128xf32>, vector<8x128xf32>, vector<8x128xf32>, vector<8x128xf32>, vector<8x128xf32>, vector<8x128xf32>, vector<8x128xf32> -> vector<64x128xf32>
    %c0_47 = arith.constant 0 : index
    %c0_48 = arith.constant 0 : index
    %255 = vector.load %arg6[%c0_47, %c0_48] : memref<128x128xf32, #tpu.memory_space<vmem>>, vector<128x128xf32>
    %cst_49 = arith.constant dense<0.000000e+00> : vector<64x128xf32>
    %256 = tpu.matmul %254, %255, %cst_49 {dimension_numbers = #tpu.dot_dimension_numbers<[1], [0], [0], [1], [0, 0, 1, 1], [], []>} : vector<64x128xf32>, vector<128x128xf32>, vector<64x128xf32> -> vector<64x128xf32>
    %c0_50 = arith.constant 0 : index
    %c0_51 = arith.constant 0 : index
    %257 = vector.load %arg7[%c0_50, %c0_51] : memref<1x128xf32, #tpu.memory_space<vmem>>, vector<1x128xf32>
    %258 = vector.broadcast %257 : vector<1x128xf32> to vector<64x128xf32>
    %259 = arith.addf %256, %258 : vector<64x128xf32>
    %260 = vector.shape_cast %259 : vector<64x128xf32> to vector<8x8x128xf32>
    %c0_52 = arith.constant 0 : index
    %c0_53 = arith.constant 0 : index
    %c0_54 = arith.constant 0 : index
    %261 = vector.load %arg8[%c0_52, %c0_53, %c0_54] : memref<8x8x128xf32, #tpu.memory_space<vmem>>, vector<8x8x128xf32>
    tpu.vector_store %arg8[%c0_52, %c0_53, %c0_54], %260 {strides = array<i32>} : memref<8x8x128xf32, #tpu.memory_space<vmem>>, vector<8x8x128xf32>,
    return
  }
  func.func @transform_0(%arg0: i32) -> (i32, i32, i32) {
    %c0_i32 = arith.constant 0 : i32
    %c0_i32_0 = arith.constant 0 : i32
    %c0_i32_1 = arith.constant 0 : i32
    return %arg0, %c0_i32, %c0_i32_0 : i32, i32, i32
  }
  func.func @transform_1(%arg0: i32) -> (i32, i32) {
    %c0_i32 = arith.constant 0 : i32
    %c0_i32_0 = arith.constant 0 : i32
    %c0_i32_1 = arith.constant 0 : i32
    return %c0_i32, %c0_i32_0 : i32, i32
  }
  func.func @transform_2(%arg0: i32) -> (i32, i32) {
    %c0_i32 = arith.constant 0 : i32
    %c0_i32_0 = arith.constant 0 : i32
    %c0_i32_1 = arith.constant 0 : i32
    return %c0_i32, %c0_i32_0 : i32, i32
  }
  func.func @transform_3(%arg0: i32) -> (i32, i32) {
    %c0_i32 = arith.constant 0 : i32
    %c0_i32_0 = arith.constant 0 : i32
    %c0_i32_1 = arith.constant 0 : i32
    return %c0_i32, %c0_i32_0 : i32, i32
  }
  func.func @transform_4(%arg0: i32) -> (i32, i32) {
    %c0_i32 = arith.constant 0 : i32
    %c0_i32_0 = arith.constant 0 : i32
    %c0_i32_1 = arith.constant 0 : i32
    return %c0_i32, %c0_i32_0 : i32, i32
  }
  func.func @transform_5(%arg0: i32) -> (i32, i32) {
    %c0_i32 = arith.constant 0 : i32
    %c0_i32_0 = arith.constant 0 : i32
    %c0_i32_1 = arith.constant 0 : i32
    return %c0_i32, %c0_i32_0 : i32, i32
  }
  func.func @transform_6(%arg0: i32) -> (i32, i32) {
    %c0_i32 = arith.constant 0 : i32
    %c0_i32_0 = arith.constant 0 : i32
    %c0_i32_1 = arith.constant 0 : i32
    return %c0_i32, %c0_i32_0 : i32, i32
  }
  func.func @transform_7(%arg0: i32) -> (i32, i32, i32) {
    %c0_i32 = arith.constant 0 : i32
    %c0_i32_0 = arith.constant 0 : i32
    %c0_i32_1 = arith.constant 0 : i32
    return %arg0, %c0_i32, %c0_i32_0 : i32, i32, i32
  }
}

</mosaic_0001>

<bundles_post_ra>
// kernel: gru_recurrent_encoder_forward.1
= control target key start
LH: loop header
LB: loop body
LE: loop exit
PB: predicated region body
PF: predicated region fallthrough
CT: control target
= control target key end

     0   :  { %vm53_vm0 = vcmask 130048   ;;  %v1360_v54 = vmov 0.0   ;;  %s2603_s1 = inlined_call_operand.vmem [shape: f32[16,384], index: 1, kind: input, shape index: {}]   ;;  %s2604_s0 = inlined_call_operand.vmem [shape: f32[8,8,16], index: 0, kind: input, shape index: {}]   ;;  %s2605_s3 = inlined_call_operand.vmem [shape: f32[128,384], index: 3, kind: input, shape index: {}]   ;;  %s2606_s2 = inlined_call_operand.vmem [shape: f32[1,384], index: 2, kind: input, shape index: {}]   ;;  %s2607_s4 = inlined_call_operand.vmem [shape: f32[1,384], index: 4, kind: input, shape index: {}]   ;;  %s2608_s5 = inlined_call_operand.vmem [shape: f32[128,128], index: 5, kind: input, shape index: {}]   ;;  %s2609_s6 = inlined_call_operand.vmem [shape: f32[1,128], index: 6, kind: input, shape index: {}]   ;;  %s2610_s7 = inlined_call_operand.vmem [shape: f32[8,8,128], index: 7, kind: output, shape index: {}]  }
   0x1   :  { %v44_v0 = vld [vmem:[%s2603_s1 + $0x28] sm:$0xff]  ;;  %v41_v1 = vld [vmem:[%s2603_s1 + $0x10] sm:$0xff]  ;;  %v1410_v2 = vld [vmem:[%s2604_s0 + $0x20] sm:$0xff] }
   0x2   :  { %1228 = vmatpush.msra.mxu3 %v44_v0  ;;  %v42_v3 = vld [vmem:[%s2603_s1 + $0x18] sm:$0xff]  ;;  %174 = vmatpush.msra.mxu2 %v44_v0  ;;  %v1418_v4 = vld [vmem:[%s2605_s3 + $0x168] sm:$0xff]  ;;  %v39_v5 = vld [vmem:[%s2603_s1] sm:$0xff] }
   0x3   :  { %92 = vmatpush.msra.mxu0 %v42_v3  ;;  %v1426_v6 = vld [vmem:[%s2604_s0] sm:$0xff]  ;;  %v1433_v7 = vld [vmem:[%s2605_s3 + $0x150] sm:$0xff]  ;;  %v1441_v8 = vld [vmem:[%s2605_s3 + $0x138] sm:$0xff] }
   0x4   :  { %1229 = vmatpush.msra.mxu3 %v41_v1  ;;  %175 = vmatpush.msra.mxu2 %v41_v1  ;;  %v1449_v9 = vld [vmem:[%s2605_s3 + $0x120] sm:$0xff]  ;;  %v1454_v10 = vld [vmem:[%s2605_s3 + $0x178] sm:$0xff]  ;;  %v1460_v11 = vld [vmem:[%s2604_s0 + $0x28] sm:$0xff] }
   0x5   :  { %1208 = vmatmul.msk.f32.vlgmr.msra.gmra.mxu3 %vm53_vm0, %v1410_v2  ;;  %93 = vmatpush.msra.mxu0 %v39_v5  ;;  %v1466_v12 = vld [vmem:[%s2605_s3 + $0x160] sm:$0xff]  ;;  %v1471_v13 = vld [vmem:[%s2605_s3 + $0x108] sm:$0xff]  ;;  %v1483_v15 = vld [vmem:[%s2605_s3 + $0x170] sm:$0xff] }
   0x6   :  { %258 = vmatpush.msrb.mxu3 %v1418_v4  ;;  %1188 = vmatmul.msk.f32.vlgmr.msra.gmra.mxu0 %vm53_vm0, %v1426_v6  ;;  %v1476_v14 = vld [vmem:[%s2604_s0 + $0x8] sm:$0xff]  ;;  %v1495_v17 = vld [vmem:[%s2605_s3 + $0xf0] sm:$0xff]  ;;  %v1504_v18 = vld [vmem:[%s2605_s3 + $0x158] sm:$0xff] }
   0x7   :  { %1204 = vmatmul.msk.f32.vlgmr.msra.gmra.mxu2 %vm53_vm0, %v1426_v6  ;;  %298 = vmatpush.msrb.mxu0 %v1454_v10  ;;  %v1488_v16 = vld [vmem:[%s2605_s3 + $0x148] sm:$0xff]  ;;  %v1509_v19 = vld [vmem:[%s2605_s3 + $0x130] sm:$0xff]  ;;  %v1514_v20 = vld [vmem:[%s2605_s3 + $0xd8] sm:$0xff] }
   0x8   :  { %259 = vmatpush.msrb.mxu3 %v1433_v7  ;;  %385 = vmatpush.msrb.mxu2 %v1483_v15  ;;  %v1522_v21 = vld [vmem:[%s2605_s3 + $0x140] sm:$0xff]  ;;  %v1527_v22 = vld [vmem:[%s2605_s3 + $0x118] sm:$0xff]  ;;  %v1542_v24 = vld [vmem:[%s2604_s0 + $0x30] sm:$0xff] }
   0x9   :  { %299 = vmatpush.msrb.mxu0 %v1466_v12  ;;  %v1534_v23 = vld [vmem:[%s2605_s3 + $0xc0] sm:$0xff]  ;;  %v1547_v25 = vld [vmem:[%s2605_s3 + $0x128] sm:$0xff]  ;;  %v1557_v27 = vld [vmem:[%s2604_s0 + $0x10] sm:$0xff] }
   0xa   :  { %260 = vmatpush.msrb.mxu3 %v1441_v8  ;;  %386 = vmatpush.msrb.mxu2 %v1504_v18  ;;  %v1552_v26 = vld [vmem:[%s2605_s3 + $0xa8] sm:$0xff]  ;;  %v1563_v28 = vld [vmem:[%s2605_s3 + $0x100] sm:$0xff]  ;;  %v1572_v29 = vld [vmem:[%s2605_s3 + $0x90] sm:$0xff] }
   0xb   :  { %300 = vmatpush.msrb.mxu0 %v1488_v16  ;;  %v1581_v30 = vld [vmem:[%s2605_s3 + $0x110] sm:$0xff]  ;;  %v1586_v31 = vld [vmem:[%s2605_s3 + $0xe8] sm:$0xff]  ;;  %v1591_v32 = vld [vmem:[%s2605_s3 + $0x78] sm:$0xff] }
   0xc   :  { %261 = vmatpush.msrb.mxu3 %v1449_v9  ;;  %387 = vmatpush.msrb.mxu2 %v1522_v21  ;;  %v1599_v33 = vld [vmem:[%s2605_s3 + $0xf8] sm:$0xff]  ;;  %v1604_v34 = vld [vmem:[%s2605_s3 + $0xd0] sm:$0xff]  ;;  %v1611_v35 = vld [vmem:[%s2605_s3 + $0x60] sm:$0xff] }
   0xd   :  { %1209 = vmatmul.msk.f32.gmra.mxu3 %vm53_vm0, %v1460_v11  ;;  %301 = vmatpush.msrb.mxu0 %v1509_v19  ;;  %v1619_v36 = vld [vmem:[%s2604_s0 + $0x38] sm:$0xff]  ;;  %v1624_v37 = vld [vmem:[%s2605_s3 + $0xe0] sm:$0xff]  ;;  %v1634_v39 = vld [vmem:[%s2605_s3 + $0x48] sm:$0xff] }
   0xe   :  { %262 = vmatpush.msrb.mxu3 %v1471_v13  ;;  %1189 = vmatmul.msk.f32.gmra.mxu0 %vm53_vm0, %v1476_v14  ;;  %v1629_v38 = vld [vmem:[%s2605_s3 + $0xb8] sm:$0xff]  ;;  %v1647_v41 = vld [vmem:[%s2605_s3 + $0xa0] sm:$0xff]  ;;  %v1654_v42 = vld [vmem:[%s2605_s3 + $0x30] sm:$0xff] }
   0xf   :  { %1205 = vmatmul.msk.f32.gmra.mxu2 %vm53_vm0, %v1476_v14  ;;  %302 = vmatpush.msrb.mxu0 %v1527_v22  ;;  %v1639_v40 = vld [vmem:[%s2604_s0 + $0x18] sm:$0xff]  ;;  %2643 = vst [vmem:[#allocation3_spill] sm:$0xff] %v1654_v42  ;;  %v1663_v43 = vld [vmem:[%s2605_s3 + $0xc8] sm:$0xff]  ;;  %v1681_v46 = vld [vmem:[%s2605_s3 + $0xb0] sm:$0xff] }
  0x10   :  { %263 = vmatpush.msrb.mxu3 %v1495_v17  ;;  %388 = vmatpush.msrb.mxu2 %v1547_v25  ;;  %v1668_v44 = vld [vmem:[%s2605_s3 + $0x88] sm:$0xff]  ;;  %v1673_v45 = vld [vmem:[%s2605_s3 + $0x18] sm:$0xff]  ;;  %v1686_v47 = vld [vmem:[%s2605_s3 + $0x70] sm:$0xff] }
  0x11   :  { %303 = vmatpush.msrb.mxu0 %v1563_v28  ;;  %2644 = vst [vmem:[#allocation4_spill] sm:$0xff] %v1673_v45  ;;  %v1693_v48 = vld [vmem:[%s2605_s3] sm:$0xff]  ;;  %v1701_v49 = vld [vmem:[%s2605_s3 + $0x98] sm:$0xff]  ;;  %v1724_v53 = vld [vmem:[%s2605_s3 + $0x28] sm:$0xff] }
  0x12   :  { %264 = vmatpush.msrb.mxu3 %v1514_v20  ;;  %389 = vmatpush.msrb.mxu2 %v1581_v30  ;;  %2645 = vst [vmem:[#allocation5_spill] sm:$0xff] %v1693_v48  ;;  %v1706_v50 = vld [vmem:[%s2605_s3 + $0x58] sm:$0xff]  ;;  %v1714_v51 = vld [vmem:[%s2605_s3 + $0x40] sm:$0xff]  ;;  %v40_v55 = vld [vmem:[%s2603_s1 + $0x8] sm:$0xff] }
  0x13   :  { %304 = vmatpush.msrb.mxu0 %v1586_v31  ;;  %2646 = vst [vmem:[#allocation6_spill] sm:$0xff] %v1714_v51  ;;  %v43_v52 = vld [vmem:[%s2603_s1 + $0x20] sm:$0xff]  ;;  %v1741_v57 = vld [vmem:[%s2605_s3 + $0x10] sm:$0xff]  ;;  %v1753_v58 = vld [vmem:[%s2605_s3 + $0x68] sm:$0xff] }
  0x14   :  { %265 = vmatpush.msrb.mxu3 %v1534_v23  ;;  %390 = vmatpush.msrb.mxu2 %v1599_v33  ;;  %2647 = vst [vmem:[#allocation7_spill] sm:$0xff] %v1724_v53  ;;  %v1736_v56 = vld [vmem:[%s2605_s3 + $0x80] sm:$0xff]  ;;  %v1762_v59 = vld [vmem:[%s2605_s3 + $0x50] sm:$0xff]  ;;  %v1772_v60 = vld [vmem:[%s2605_s3 + $0x38] sm:$0xff] }
  0x15   :  { %1210 = vmatmul.msk.f32.gmra.mxu3 %vm53_vm0, %v1542_v24  ;;  %305 = vmatpush.msrb.mxu0 %v1604_v34  ;;  %2648 = vst [vmem:[#allocation8_spill] sm:$0xff] %v1741_v57  ;;  %v1781_v61 = vld [vmem:[%s2605_s3 + $0x20] sm:$0xff]  ;;  %v1791_v62 = vld [vmem:[%s2605_s3 + $0x8] sm:$0xff] }
  0x16   :  { %266 = vmatpush.msrb.mxu3 %v1552_v26  ;;  %1190 = vmatmul.msk.f32.gmra.mxu0 %vm53_vm0, %v1557_v27  ;;  %2649 = vst [vmem:[#allocation9_spill] sm:$0xff] %v1762_v59  ;;  %v45_v0 = vld [vmem:[%s2606_s2] sm:$0x7] }
  0x17   :  { %1206 = vmatmul.msk.f32.gmra.mxu2 %vm53_vm0, %v1557_v27  ;;  %306 = vmatpush.msrb.mxu0 %v1629_v38  ;;  %2650 = vst [vmem:[#allocation10_spill] sm:$0xff] %v1772_v60 }
  0x18   :  { %267 = vmatpush.msrb.mxu3 %v1572_v29  ;;  %391 = vmatpush.msrb.mxu2 %v1624_v37  ;;  %2651 = vst [vmem:[#allocation11_spill] sm:$0xff] %v1781_v61 }
  0x19   :  { %307 = vmatpush.msrb.mxu0 %v1647_v41  ;;  %133 = vmatpush.msra.mxu1 %v43_v52  ;;  %2652 = vst [vmem:[#allocation12_spill] sm:$0xff] %v1791_v62 }
  0x1a   :  { %268 = vmatpush.msrb.mxu3 %v1591_v32  ;;  %392 = vmatpush.msrb.mxu2 %v1663_v43 }
  0x1b   :  { %308 = vmatpush.msrb.mxu0 %v1668_v44  ;;  %134 = vmatpush.msra.mxu1 %v40_v55 }
  0x1c   :  { %269 = vmatpush.msrb.mxu3 %v1611_v35  ;;  %393 = vmatpush.msrb.mxu2 %v1681_v46 }
  0x1d   :  { %1211 = vmatmul.msk.f32.gmra.mxu3 %vm53_vm0, %v1619_v36  ;;  %309 = vmatpush.msrb.mxu0 %v1686_v47 }
  0x1e   :  { %270 = vmatpush.msrb.mxu3 %v1634_v39  ;;  %1191 = vmatmul.msk.f32.gmra.mxu0 %vm53_vm0, %v1639_v40 }
  0x1f   :  { %1207 = vmatmul.msk.f32.gmra.mxu2 %vm53_vm0, %v1639_v40  ;;  %310 = vmatpush.msrb.mxu0 %v1706_v50 }
  0x20   :  { %271 = vmatpush.msrb.mxu3 %v1654_v42  ;;  %394 = vmatpush.msrb.mxu2 %v1701_v49 }
  0x21   :  { %311 = vmatpush.msrb.mxu0 %v1714_v51  ;;  %1196 = vmatmul.msk.f32.vlgmr.msra.gmra.mxu1 %vm53_vm0, %v1426_v6 }
  0x22   :  { %272 = vmatpush.msrb.mxu3 %v1673_v45  ;;  %395 = vmatpush.msrb.mxu2 %v1736_v56 }
  0x23   :  { %312 = vmatpush.msrb.mxu0 %v1724_v53  ;;  %365 = vmatpush.msrb.mxu1 %v1418_v4 }
  0x24   :  { %273 = vmatpush.msrb.mxu3 %v1693_v48  ;;  %396 = vmatpush.msrb.mxu2 %v1753_v58 }
  0x25   :  { %274 = vmatmul.f32.vlgmr.msrb.gmra.mxu3 %v1360_v54  ;;  %313 = vmatpush.msrb.mxu0 %v1741_v57 }
  0x26   :  { %278 = vmatpush.msra.mxu3 %v1483_v15  ;;  %1192 = vmatmul.msk.f32.gmra.mxu0 %vm53_vm0, %v1410_v2 }
  0x27   :  { %472 = vmatpush.msra.mxu0 %v1418_v4  ;;  %366 = vmatpush.msrb.mxu1 %v1433_v7 }
  0x28   :  { %279 = vmatpush.msra.mxu3 %v1504_v18  ;;  %397 = vmatpush.msrb.mxu2 %v1762_v59 }
  0x29   :  { %367 = vmatpush.msrb.mxu1 %v1441_v8  ;;  %473 = vmatpush.msra.mxu0 %v1433_v7 }
  0x2a   :  { %280 = vmatpush.msra.mxu3 %v1522_v21  ;;  %398 = vmatpush.msrb.mxu2 %v1772_v60 }
  0x2b   :  { %368 = vmatpush.msrb.mxu1 %v1449_v9  ;;  %474 = vmatpush.msra.mxu0 %v1441_v8 }
  0x2c   :  { %281 = vmatpush.msra.mxu3 %v1547_v25  ;;  %1197 = vmatmul.msk.f32.gmra.mxu1 %vm53_vm0, %v1476_v14 }
  0x2d   :  { %399 = vmatpush.msrb.mxu2 %v1781_v61  ;;  %369 = vmatpush.msrb.mxu1 %v1471_v13 }
  0x2e   :  { %282 = vmatpush.msra.mxu3 %v1581_v30  ;;  %1193 = vmatmul.msk.f32.gmra.mxu0 %vm53_vm0, %v1460_v11 }
  0x2f   :  { %400 = vmatpush.msrb.mxu2 %v1791_v62  ;;  %370 = vmatpush.msrb.mxu1 %v1495_v17 }
  0x30   :  { %283 = vmatpush.msra.mxu3 %v1599_v33  ;;  %475 = vmatpush.msra.mxu0 %v1449_v9 }
  0x31   :  { %512 = vmatpush.msra.mxu2 %v1454_v10  ;;  %371 = vmatpush.msrb.mxu1 %v1514_v20 }
  0x32   :  { %284 = vmatpush.msra.mxu3 %v1624_v37  ;;  %476 = vmatpush.msra.mxu0 %v1471_v13 }
  0x33   :  { %513 = vmatpush.msra.mxu2 %v1466_v12  ;;  %372 = vmatpush.msrb.mxu1 %v1534_v23 }
  0x34   :  { %285 = vmatpush.msra.mxu3 %v1663_v43  ;;  %1198 = vmatmul.msk.f32.gmra.mxu1 %vm53_vm0, %v1557_v27 }
  0x35   :  { %514 = vmatpush.msra.mxu2 %v1488_v16  ;;  %373 = vmatpush.msrb.mxu1 %v1552_v26 }
  0x36   :  { %286 = vmatpush.msra.mxu3 %v1681_v46  ;;  %1194 = vmatmul.msk.f32.gmra.mxu0 %vm53_vm0, %v1542_v24 }
  0x37   :  { %515 = vmatpush.msra.mxu2 %v1509_v19  ;;  %374 = vmatpush.msrb.mxu1 %v1572_v29 }
  0x38   :  { %287 = vmatpush.msra.mxu3 %v1701_v49  ;;  %477 = vmatpush.msra.mxu0 %v1495_v17 }
  0x39   :  { %516 = vmatpush.msra.mxu2 %v1527_v22  ;;  %375 = vmatpush.msrb.mxu1 %v1591_v32 }
  0x3a   :  { %288 = vmatpush.msra.mxu3 %v1736_v56  ;;  %478 = vmatpush.msra.mxu0 %v1514_v20 }
  0x3b   :  { %517 = vmatpush.msra.mxu2 %v1563_v28  ;;  %376 = vmatpush.msrb.mxu1 %v1611_v35 }
  0x3c   :  { %289 = vmatpush.msra.mxu3 %v1753_v58  ;;  %1199 = vmatmul.msk.f32.gmra.mxu1 %vm53_vm0, %v1639_v40 }
  0x3d   :  { %377 = vmatpush.msrb.mxu1 %v1634_v39  ;;  %518 = vmatpush.msra.mxu2 %v1586_v31 }
  0x3e   :  { %290 = vmatpush.msra.mxu3 %v1762_v59  ;;  %1195 = vmatmul.msk.f32.gmra.mxu0 %vm53_vm0, %v1619_v36 }
  0x3f   :  { %378 = vmatpush.msrb.mxu1 %v1654_v42  ;;  %519 = vmatpush.msra.mxu2 %v1604_v34 }
  0x40   :  { %291 = vmatpush.msra.mxu3 %v1772_v60  ;;  %479 = vmatpush.msra.mxu0 %v1534_v23 }
  0x41   :  { %379 = vmatpush.msrb.mxu1 %v1673_v45  ;;  %520 = vmatpush.msra.mxu2 %v1629_v38 }
  0x42   :  { %292 = vmatpush.msra.mxu3 %v1781_v61  ;;  %480 = vmatpush.msra.mxu0 %v1552_v26 }
  0x43   :  { %380 = vmatpush.msrb.mxu1 %v1693_v48  ;;  %521 = vmatpush.msra.mxu2 %v1647_v41 }
  0x44   :  { %293 = vmatpush.msra.mxu3 %v1791_v62  ;;  %1200 = vmatmul.msk.f32.gmra.mxu1 %vm53_vm0, %v1410_v2  ;;  %v47_v2 = vperm.slane %v45_v0, 0 }
  0x45   :  { %294 = vmatmul.f32.vlgmr.msra.gmra.mxu3 %v1360_v54  ;;  %492 = vmatpush.msra.mxu1 %v1483_v15 }
  0x46   :  { %405 = vmatpush.msrb.mxu3 %v1454_v10  ;;  %314 = vmatmul.f32.vlgmr.msrb.gmra.mxu0 %v1360_v54  ;;  %v249_v54 = vld [vmem:[%s2607_s4] sm:$0x7] }
  0x47   :  { %481 = vmatpush.msra.mxu0 %v1572_v29  ;;  %493 = vmatpush.msra.mxu1 %v1504_v18 }
  0x48   :  { %406 = vmatpush.msrb.mxu3 %v1466_v12  ;;  %522 = vmatpush.msra.mxu2 %v1668_v44 }
  0x49   :  { %482 = vmatpush.msra.mxu0 %v1591_v32  ;;  %494 = vmatpush.msra.mxu1 %v1522_v21 }
  0x4a   :  { %407 = vmatpush.msrb.mxu3 %v1488_v16  ;;  %523 = vmatpush.msra.mxu2 %v1686_v47 }
  0x4b   :  { %483 = vmatpush.msra.mxu0 %v1611_v35  ;;  %495 = vmatpush.msra.mxu1 %v1547_v25 }
  0x4c   :  { %408 = vmatpush.msrb.mxu3 %v1509_v19  ;;  %1201 = vmatmul.msk.f32.gmra.mxu1 %vm53_vm0, %v1460_v11 }
  0x4d   :  { %484 = vmatpush.msra.mxu0 %v1634_v39  ;;  %496 = vmatpush.msra.mxu1 %v1581_v30 }
  0x4e   :  { %409 = vmatpush.msrb.mxu3 %v1527_v22  ;;  %524 = vmatpush.msra.mxu2 %v1706_v50 }
  0x4f   :  { %485 = vmatpush.msra.mxu0 %v1654_v42  ;;  %497 = vmatpush.msra.mxu1 %v1599_v33 }
  0x50   :  { %410 = vmatpush.msrb.mxu3 %v1563_v28  ;;  %525 = vmatpush.msra.mxu2 %v1714_v51 }
  0x51   :  { %486 = vmatpush.msra.mxu0 %v1673_v45  ;;  %498 = vmatpush.msra.mxu1 %v1624_v37 }
  0x52   :  { %411 = vmatpush.msrb.mxu3 %v1586_v31  ;;  %526 = vmatpush.msra.mxu2 %v1724_v53 }
  0x53   :  { %487 = vmatpush.msra.mxu0 %v1693_v48  ;;  %499 = vmatpush.msra.mxu1 %v1663_v43 }
  0x54   :  { %412 = vmatpush.msrb.mxu3 %v1604_v34  ;;  %1202 = vmatmul.msk.f32.gmra.mxu1 %vm53_vm0, %v1542_v24 }
  0x55   :  { %527 = vmatpush.msra.mxu2 %v1741_v57  ;;  %500 = vmatpush.msra.mxu1 %v1681_v46 }
  0x56   :  { %413 = vmatpush.msrb.mxu3 %v1629_v38  ;;  %599 = vmatpush.msrb.mxu0 %v1483_v15 }
  0x57   :  { %501 = vmatpush.msra.mxu1 %v1701_v49 }
  0x58   :  { %414 = vmatpush.msrb.mxu3 %v1647_v41  ;;  %600 = vmatpush.msrb.mxu0 %v1504_v18 }
  0x59   :  { %502 = vmatpush.msra.mxu1 %v1736_v56 }
  0x5a   :  { %415 = vmatpush.msrb.mxu3 %v1668_v44  ;;  %601 = vmatpush.msrb.mxu0 %v1522_v21 }
  0x5b   :  { %503 = vmatpush.msra.mxu1 %v1753_v58 }
  0x5c   :  { %416 = vmatpush.msrb.mxu3 %v1686_v47  ;;  %1203 = vmatmul.msk.f32.gmra.mxu1 %vm53_vm0, %v1619_v36 }
  0x5d   :  { %602 = vmatpush.msrb.mxu0 %v1547_v25  ;;  %504 = vmatpush.msra.mxu1 %v1762_v59 }
  0x5e   :  { %417 = vmatpush.msrb.mxu3 %v1706_v50 }
  0x5f   :  { %603 = vmatpush.msrb.mxu0 %v1581_v30  ;;  %505 = vmatpush.msra.mxu1 %v1772_v60 }
  0x60   :  { %418 = vmatpush.msrb.mxu3 %v1714_v51 }
  0x61   :  { %604 = vmatpush.msrb.mxu0 %v1599_v33  ;;  %506 = vmatpush.msra.mxu1 %v1781_v61 }
  0x62   :  { %419 = vmatpush.msrb.mxu3 %v1724_v53 }
  0x63   :  { %605 = vmatpush.msrb.mxu0 %v1624_v37  ;;  %507 = vmatpush.msra.mxu1 %v1791_v62 }
  0x64   :  { %420 = vmatpush.msrb.mxu3 %v1741_v57 }
  0x65   :  { %606 = vmatpush.msrb.mxu0 %v1663_v43 }
  0x66   :  { %579 = vmatpush.msra.mxu3 %v1418_v4 }
  0x67   :  { %607 = vmatpush.msrb.mxu0 %v1681_v46 }
  0x68   :  { %580 = vmatpush.msra.mxu3 %v1433_v7 }
  0x69   :  { %608 = vmatpush.msrb.mxu0 %v1701_v49 }
  0x6a   :  { %581 = vmatpush.msra.mxu3 %v1441_v8 }
  0x6b   :  { %609 = vmatpush.msrb.mxu0 %v1736_v56 }
  0x6c   :  { %582 = vmatpush.msra.mxu3 %v1449_v9 }
  0x6d   :  { %610 = vmatpush.msrb.mxu0 %v1753_v58 }
  0x6e   :  { %583 = vmatpush.msra.mxu3 %v1471_v13 }
  0x6f   :  { %611 = vmatpush.msrb.mxu0 %v1762_v59 }
  0x70   :  { %584 = vmatpush.msra.mxu3 %v1495_v17 }
  0x71   :  { %612 = vmatpush.msrb.mxu0 %v1772_v60 }
  0x72   :  { %585 = vmatpush.msra.mxu3 %v1514_v20 }
  0x73   :  { %613 = vmatpush.msrb.mxu0 %v1781_v61  ;;  %v1957_v61 = vperm.slane %v45_v0, 1 }
  0x74   :  { %586 = vmatpush.msra.mxu3 %v1534_v23 }
  0x75   :  { %614 = vmatpush.msrb.mxu0 %v1791_v62  ;;  %2665 = vst [vmem:[#allocation25_spill] sm:$0xff] %v1957_v61 }
  0x76   :  { %587 = vmatpush.msra.mxu3 %v1552_v26 }
  0x78   :  { %588 = vmatpush.msra.mxu3 %v1572_v29 }
  0x7a   :  { %589 = vmatpush.msra.mxu3 %v1591_v32 }
  0x7c   :  { %590 = vmatpush.msra.mxu3 %v1611_v35 }
  0x7e   :  { %591 = vmatpush.msra.mxu3 %v1634_v39 }
  0x80   :  { %592 = vmatpush.msra.mxu3 %v1654_v42 }
  0x82   :  { %593 = vmatpush.msra.mxu3 %v1673_v45 }
  0x83   :  { %v95_v63 = vpop.f32.mrf.mxu0 }
  0x84   :  { %594 = vmatpush.msra.mxu3 %v1693_v48 }
  0x88   :  { %v1929_v1 = vpop.f32.mrf.mxu3 }
  0x89   :  { %2653 = vst [vmem:[#allocation13_spill] sm:$0xff] %v1929_v1  ;;  %v96_v1 = vadd.f32 %v95_v63, %v47_v2 }
  0x8b   :  { %v98_v3 = vpop.f32.mrf.mxu0 }
  0x8c   :  { %v1931_v5 = vadd.f32 %v98_v3, %v47_v2  ;;  %v1948_v3 = vperm.slane %v249_v54, 0 }
  0x8e   :  { %2654 = vst [vmem:[#allocation14_spill] sm:$0xff] %v1931_v5 }
  0x8f   :  { %2661 = vst [vmem:[#allocation21_spill] sm:$0xff] %v1948_v3 }
  0x90   :  { %v1933_v6 = vpop.f32.mrf.mxu3 }
  0x91   :  { %2655 = vst [vmem:[#allocation15_spill] sm:$0xff] %v1933_v6 }
  0x93   :  { %v101_v11 = vpop.f32.mrf.mxu0 }
  0x94   :  { %v1935_v14 = vadd.f32 %v101_v11, %v47_v2 }
  0x96   :  { %2656 = vst [vmem:[#allocation16_spill] sm:$0xff] %v1935_v14 }
  0x98   :  { %v1937_v24 = vpop.f32.mrf.mxu3 }
  0x99   :  { %2657 = vst [vmem:[#allocation17_spill] sm:$0xff] %v1937_v24 }
  0x9b   :  { %v104_v27 = vpop.f32.mrf.mxu0 }
  0x9c   :  { %v1939_v36 = vadd.f32 %v104_v27, %v47_v2 }
  0x9e   :  { %2658 = vst [vmem:[#allocation18_spill] sm:$0xff] %v1939_v36  ;;  %v136_v63 = vpop.f32.mrf.mxu1 }
  0xa0   :  { %v1941_v40 = vpop.f32.mrf.mxu3 }
  0xa1   :  { %2659 = vst [vmem:[#allocation19_spill] sm:$0xff] %v1941_v40 }
  0xa3   :  { %v107_v52 = vpop.f32.mrf.mxu0 }
  0xa4   :  { %v1946_v55 = vadd.f32 %v107_v52, %v47_v2 }
  0xa6   :  { %2660 = vst [vmem:[#allocation20_spill] sm:$0xff] %v1946_v55 }
  0xa8   :  { %v275_v6 = vpop.f32.mrf.mxu3 }
  0xa9   :  { %v276_v11 = vadd.f32 %v275_v6, %v1948_v3  ;;  %v1959_v6 = vperm.slane %v249_v54, 1 }
  0xab   :  { %v110_v14 = vpop.f32.mrf.mxu0  ;;  %v318_v24 = vadd.f32 %v276_v11, %v96_v1  ;;  %2666 = vst [vmem:[#allocation26_spill] sm:$0xff] %v1959_v6 }
  0xac   :  { %v1951_v5 = vadd.f32 %v110_v14, %v47_v2  ;;  %v137_v14 = vadd.f32 %v136_v63, %v1957_v61 }
  0xad   :  { %v1212_v27 = vmul.f32 -1.442695, %v318_v24 }
  0xae   :  { %2662 = vst [vmem:[#allocation22_spill] sm:$0xff] %v1951_v5 }
  0xaf   :  { %1232 = vpow2.f32 %v1212_v27 }
  0xb3   :  { %v113_v40 = vpop.f32.mrf.mxu0 }
  0xb4   :  { %v1953_v36 = vadd.f32 %v113_v40, %v47_v2 }
  0xb5   :  { %v1233_v62 = vpop.eup %1232 }
  0xb6   :  { %2663 = vst [vmem:[#allocation23_spill] sm:$0xff] %v1953_v36  ;;  %v322_v48 = vadd.f32 1.0, %v1233_v62 }
  0xb8   :  { %1234 = vrcp.f32 %v322_v48  ;;  %vm328_vm2 = vweird.f32 %v322_v48 }
  0xbb   :  { %v116_v57 = vpop.f32.mrf.mxu0 }
  0xbc   :  { %v1955_v52 = vadd.f32 %v116_v57, %v47_v2  ;;  %v334_v57 = vand.u32 2147483648, %v322_v48  ;;  %v1963_v2 = vperm.slane %v249_v54, 2 }
  0xbe   :  { %2664 = vst [vmem:[#allocation24_spill] sm:$0xff] %v1955_v52  ;;  %v1235_v55 = vpop.eup %1234  ;;  %v332_v52 = vand.u32 2147483647, %v322_v48  ;;  %v335_v61 = vor.u32 1.1754944e-38, %v334_v57 }
  0xbf   :  { %v324_v1 = vmul.f32 %v1235_v55, %v322_v48  ;;  %vm329_vm1 = vweird.f32 %v1235_v55 }
  0xc0   :  { %vm330_vm3 = vmor %vm328_vm2, %vm329_vm1  ;;  %vm333_vm4 = vcmp.eq.f32.partialorder %v332_v52, 8.507059e+37 }
  0xc1   :  { %v325_v40 = vsub.f32 1.0, %v324_v1 }
  0xc3   :  { %v326_v62 = vmul.f32 %v1235_v55, %v325_v40  ;;  %v315_v45 = vpop.f32.mrf.mxu0 }
  0xc4   :  { %v316_v1 = vadd.f32 %v315_v45, %v1963_v2 }
  0xc5   :  { %v327_v5 = vadd.f32 %v1235_v55, %v326_v62 }
  0xc7   :  { %v331_v63 = vsel %vm330_vm3, %v1235_v55, %v327_v5 }
  0xc8   :  { %v295_v24 = vpop.f32.mrf.mxu3 }
  0xc9   :  { %v296_v11 = vadd.f32 %v295_v24, %v1959_v6  ;;  %v177_v24 = vpop.f32.mrf.mxu2 }
  0xcb   :  { %v338_v27 = vadd.f32 %v296_v11, %v137_v14  ;;  %v336_v14 = vsel %vm333_vm4, %v335_v61, %v331_v63 }
  0xcc   :  { %v358_v11 = vmul.f32 %v336_v14, %v316_v1  ;;  %v2671_v14 = vld [vmem:[#allocation11_spill] sm:$0xff] }
  0xcd   :  { %v1213_v36 = vmul.f32 -1.442695, %v338_v27 }
  0xcf   :  { %1236 = vpow2.f32 %v1213_v36  ;;  %v1966_v36 = vperm.slane %v45_v0, 2 }
  0xd1   :  { %v178_v54 = vadd.f32 %v177_v24, %v1966_v36  ;;  %v2672_v24 = vld [vmem:[#allocation8_spill] sm:$0xff] }
  0xd3   :  { %v359_v48 = vadd.f32 %v358_v11, %v178_v54  ;;  %v2673_v11 = vld [vmem:[#allocation5_spill] sm:$0xff]  ;;  %v2674_v54 = vld [vmem:[#allocation12_spill] sm:$0xff] }
  0xd5   :  { %v1237_v3 = vpop.eup %1236 }
  0xd6   :  { %v342_v53 = vadd.f32 1.0, %v1237_v3 }
  0xd8   :  { %1238 = vrcp.f32 %v342_v53  ;;  %v354_v6 = vand.u32 2147483648, %v342_v53  ;;  %v352_v5 = vand.u32 2147483647, %v342_v53  ;;  %vm348_vm6 = vweird.f32 %v342_v53 }
  0xd9   :  { %1240 = vtanh.f32 %v359_v48 }
  0xda   :  { %v355_v45 = vor.u32 1.1754944e-38, %v354_v6  ;;  %vm353_vm8 = vcmp.eq.f32.partialorder %v352_v5, 8.507059e+37  ;;  %v2670_v6 = vld [vmem:[#allocation4_spill] sm:$0xff] }
  0xde   :  { %v1239_v40 = vpop.eup %1238 }
  0xdf   :  { %v344_v27 = vmul.f32 %v1239_v40, %v342_v53  ;;  %vm349_vm5 = vweird.f32 %v1239_v40  ;;  %v1241_v52 = vpop.eup %1240  ;;  %v2668_v53 = vld [vmem:[#allocation10_spill] sm:$0xff] }
  0xe0   :  { %vm350_vm7 = vmor %vm348_vm6, %vm349_vm5 }
  0xe1   :  { %v345_v62 = vsub.f32 1.0, %v344_v27 }
  0xe3   :  { %v346_v60 = vmul.f32 %v1239_v40, %v345_v62 }
  0xe5   :  { %v347_v55 = vadd.f32 %v1239_v40, %v346_v60  ;;  %v2669_v60 = vld [vmem:[#allocation7_spill] sm:$0xff] }
  0xe7   :  { %v351_v61 = vsel %vm350_vm7, %v1239_v40, %v347_v55  ;;  %v139_v40 = vpop.f32.mrf.mxu1  ;;  %v180_v55 = vpop.f32.mrf.mxu2 }
  0xe8   :  { %v356_v0 = vsel %vm353_vm8, %v355_v45, %v351_v61 }
  0xe9   :  { %v361_v3 = vsub.f32 1.0, %v356_v0  ;;  %v363_v63 = vmul.f32 0.0, %v356_v0 }
  0xeb   :  { %v362_v57 = vmul.f32 %v1241_v52, %v361_v3 }
  0xed   :  { %v1969_v1 = vadd.f32 %v363_v63, %v362_v57  ;;  %v2683_v57 = vld [vmem:[#allocation21_spill] sm:$0xff] }
  0xef   :  { %2667 = vst [vmem:[#allocation27_spill] sm:$0xff] %v1969_v1  ;;  %381 = vmatmul.f32.vlgmr.msrb.gmra.mxu1 %v1969_v1  ;;  %401 = vmatmul.f32.vlgmr.msrb.gmra.mxu2 %v1969_v1  ;;  %v2022_v27 = vpop.f32.mrf.mxu1  ;;  %v2032_v61 = vpop.f32.mrf.mxu2 }
  0xf0   :  { %421 = vmatmul.f32.vlgmr.msrb.gmra.mxu3 %v1969_v1  ;;  %619 = vmatpush.msrb.mxu1 %v1454_v10  ;;  %2675 = vst [vmem:[#allocation28_spill] sm:$0xff] %v2022_v27 }
  0xf1   :  { %686 = vmatpush.msrb.mxu2 %v1418_v4  ;;  %706 = vmatpush.msrb.mxu3 %v1483_v15  ;;  %2680 = vst [vmem:[#allocation33_spill] sm:$0xff] %v2032_v61 }
  0xf2   :  { %620 = vmatpush.msrb.mxu1 %v1466_v12 }
  0xf3   :  { %687 = vmatpush.msrb.mxu2 %v1433_v7  ;;  %707 = vmatpush.msrb.mxu3 %v1504_v18 }
  0xf4   :  { %621 = vmatpush.msrb.mxu1 %v1488_v16 }
  0xf5   :  { %688 = vmatpush.msrb.mxu2 %v1441_v8  ;;  %708 = vmatpush.msrb.mxu3 %v1522_v21 }
  0xf6   :  { %622 = vmatpush.msrb.mxu1 %v1509_v19 }
  0xf7   :  { %689 = vmatpush.msrb.mxu2 %v1449_v9  ;;  %709 = vmatpush.msrb.mxu3 %v1547_v25  ;;  %v2024_v48 = vpop.f32.mrf.mxu1  ;;  %v2036_v3 = vpop.f32.mrf.mxu2 }
  0xf8   :  { %623 = vmatpush.msrb.mxu1 %v1527_v22  ;;  %2676 = vst [vmem:[#allocation29_spill] sm:$0xff] %v2024_v48 }
  0xf9   :  { %690 = vmatpush.msrb.mxu2 %v1471_v13  ;;  %710 = vmatpush.msrb.mxu3 %v1581_v30  ;;  %2682 = vst [vmem:[#allocation35_spill] sm:$0xff] %v2036_v3 }
  0xfa   :  { %624 = vmatpush.msrb.mxu1 %v1563_v28 }
  0xfb   :  { %691 = vmatpush.msrb.mxu2 %v1495_v17  ;;  %711 = vmatpush.msrb.mxu3 %v1599_v33 }
  0xfc   :  { %625 = vmatpush.msrb.mxu1 %v1586_v31 }
  0xfd   :  { %692 = vmatpush.msrb.mxu2 %v1514_v20  ;;  %712 = vmatpush.msrb.mxu3 %v1624_v37 }
  0xfe   :  { %626 = vmatpush.msrb.mxu1 %v1604_v34 }
  0xff   :  { %693 = vmatpush.msrb.mxu2 %v1534_v23  ;;  %713 = vmatpush.msrb.mxu3 %v1663_v43  ;;  %v2026_v62 = vpop.f32.mrf.mxu1 }
 0x100   :  { %627 = vmatpush.msrb.mxu1 %v1629_v38  ;;  %2677 = vst [vmem:[#allocation30_spill] sm:$0xff] %v2026_v62 }
 0x101   :  { %694 = vmatpush.msrb.mxu2 %v1552_v26  ;;  %714 = vmatpush.msrb.mxu3 %v1681_v46 }
 0x102   :  { %628 = vmatpush.msrb.mxu1 %v1647_v41 }
 0x103   :  { %695 = vmatpush.msrb.mxu2 %v1572_v29  ;;  %715 = vmatpush.msrb.mxu3 %v1701_v49 }
 0x104   :  { %629 = vmatpush.msrb.mxu1 %v1668_v44 }
 0x105   :  { %696 = vmatpush.msrb.mxu2 %v1591_v32  ;;  %716 = vmatpush.msrb.mxu3 %v1736_v56 }
 0x106   :  { %630 = vmatpush.msrb.mxu1 %v1686_v47 }
 0x107   :  { %697 = vmatpush.msrb.mxu2 %v1611_v35  ;;  %717 = vmatpush.msrb.mxu3 %v1753_v58  ;;  %v2028_v5 = vpop.f32.mrf.mxu1 }
 0x108   :  { %631 = vmatpush.msrb.mxu1 %v1706_v50  ;;  %2678 = vst [vmem:[#allocation31_spill] sm:$0xff] %v2028_v5  ;;  %v2686_v5 = vld [vmem:[#allocation26_spill] sm:$0xff] }
 0x109   :  { %698 = vmatpush.msrb.mxu2 %v1634_v39  ;;  %718 = vmatpush.msrb.mxu3 %v1762_v59 }
 0x10a   :  { %632 = vmatpush.msrb.mxu1 %v1714_v51 }
 0x10b   :  { %699 = vmatpush.msrb.mxu2 %v1654_v42  ;;  %719 = vmatpush.msrb.mxu3 %v2668_v53 }
 0x10c   :  { %633 = vmatpush.msrb.mxu1 %v2669_v60 }
 0x10d   :  { %700 = vmatpush.msrb.mxu2 %v2670_v6  ;;  %720 = vmatpush.msrb.mxu3 %v2671_v14 }
 0x10e   :  { %634 = vmatpush.msrb.mxu1 %v2672_v24  ;;  %v2685_v24 = vld [vmem:[#allocation25_spill] sm:$0xff] }
 0x10f   :  { %701 = vmatpush.msrb.mxu2 %v2673_v11  ;;  %721 = vmatpush.msrb.mxu3 %v2674_v54  ;;  %v2030_v45 = vpop.f32.mrf.mxu1  ;;  %v2684_v54 = vld [vmem:[#allocation14_spill] sm:$0xff]  ;;  %v140_v62 = vadd.f32 %v139_v40, %v2685_v24 }
 0x110   :  { %2679 = vst [vmem:[#allocation32_spill] sm:$0xff] %v2030_v45 }
 0x117   :  { %v2034_v0 = vpop.f32.mrf.mxu1 }
 0x118   :  { %2681 = vst [vmem:[#allocation34_spill] sm:$0xff] %v2034_v0 }
 0x16c   :  { %v382_v52 = vpop.f32.mrf.mxu1 }
 0x16d   :  { %v383_v63 = vadd.f32 %v382_v52, %v2683_v57 }
 0x16f   :  { %v425_v27 = vadd.f32 %v383_v63, %v2684_v54 }
 0x171   :  { %v1214_v11 = vmul.f32 -1.442695, %v425_v27 }
 0x172   :  { %v402_v48 = vpop.f32.mrf.mxu2 }
 0x173   :  { %1242 = vpow2.f32 %v1214_v11  ;;  %v403_v14 = vadd.f32 %v402_v48, %v2686_v5  ;;  %v422_v11 = vpop.f32.mrf.mxu3 }
 0x175   :  { %v445_v6 = vadd.f32 %v403_v14, %v140_v62 }
 0x177   :  { %v1215_v45 = vmul.f32 -1.442695, %v445_v6 }
 0x179   :  { %v1243_v60 = vpop.eup %1242  ;;  %1244 = vpow2.f32 %v1215_v45  ;;  %v181_v45 = vadd.f32 %v180_v55, %v1966_v36 }
 0x17a   :  { %v429_v61 = vadd.f32 1.0, %v1243_v60  ;;  %v423_v60 = vadd.f32 %v422_v11, %v1963_v2 }
 0x17c   :  { %1246 = vrcp.f32 %v429_v61  ;;  %v441_v54 = vand.u32 2147483648, %v429_v61  ;;  %v439_v63 = vand.u32 2147483647, %v429_v61  ;;  %vm435_vm10 = vweird.f32 %v429_v61 }
 0x17e   :  { %v442_v6 = vor.u32 1.1754944e-38, %v441_v54  ;;  %vm440_vm12 = vcmp.eq.f32.partialorder %v439_v63, 8.507059e+37 }
 0x17f   :  { %v1245_v0 = vpop.eup %1244 }
 0x180   :  { %v449_v3 = vadd.f32 1.0, %v1245_v0 }
 0x182   :  { %v1247_v53 = vpop.eup %1246  ;;  %1248 = vrcp.f32 %v449_v3  ;;  %v459_v42 = vand.u32 2147483647, %v449_v3  ;;  %vm455_vm14 = vweird.f32 %v449_v3 }
 0x183   :  { %v431_v52 = vmul.f32 %v1247_v53, %v429_v61  ;;  %vm436_vm9 = vweird.f32 %v1247_v53 }
 0x184   :  { %vm437_vm11 = vmor %vm435_vm10, %vm436_vm9  ;;  %vm460_vm0 = vcmp.eq.f32.partialorder %v459_v42, 8.507059e+37 }
 0x185   :  { %v432_v57 = vsub.f32 1.0, %v431_v52 }
 0x187   :  { %v433_v27 = vmul.f32 %v1247_v53, %v432_v57  ;;  %v461_v57 = vand.u32 2147483648, %v449_v3 }
 0x188   :  { %v1249_v40 = vpop.eup %1248 }
 0x189   :  { %v451_v24 = vmul.f32 %v1249_v40, %v449_v3  ;;  %v434_v48 = vadd.f32 %v1247_v53, %v433_v27  ;;  %vm456_vm13 = vweird.f32 %v1249_v40  ;;  %v462_v61 = vor.u32 1.1754944e-38, %v461_v57 }
 0x18a   :  { %vm457_vm15 = vmor %vm455_vm14, %vm456_vm13 }
 0x18b   :  { %v452_v14 = vsub.f32 1.0, %v451_v24  ;;  %v438_v62 = vsel %vm437_vm11, %v1247_v53, %v434_v48 }
 0x18c   :  { %v443_v0 = vsel %vm440_vm12, %v442_v6, %v438_v62 }
 0x18d   :  { %v453_v52 = vmul.f32 %v1249_v40, %v452_v14  ;;  %v465_v5 = vmul.f32 %v443_v0, %v423_v60  ;;  %v2703_v60 = vld [vmem:[#allocation33_spill] sm:$0xff] }
 0x18e   :  { %v184_v62 = vadd.f32 %v2703_v60, %v1966_v36  ;;  %v2366_v60 = vld [vmem:[%s2605_s3] sm:$0xff] }
 0x18f   :  { %v454_v51 = vadd.f32 %v1249_v40, %v453_v52  ;;  %v466_v59 = vadd.f32 %v465_v5, %v181_v45 }
 0x191   :  { %v458_v27 = vsel %vm457_vm15, %v1249_v40, %v454_v51  ;;  %1250 = vtanh.f32 %v466_v59 }
 0x192   :  { %v463_v24 = vsel %vm460_vm0, %v462_v61, %v458_v27 }
 0x193   :  { %v468_v54 = vsub.f32 1.0, %v463_v24  ;;  %v470_v55 = vmul.f32 %v463_v24, %v1969_v1 }
 0x197   :  { %v1251_v53 = vpop.eup %1250 }
 0x198   :  { %v469_v63 = vmul.f32 %v1251_v53, %v468_v54 }
 0x19a   :  { %v2045_v11 = vadd.f32 %v470_v55, %v469_v63 }
 0x19c   :  { %2687 = vst [vmem:[#allocation14_spill] sm:$0xff] %v2045_v11  ;;  %488 = vmatmul.f32.vlgmr.msra.gmra.mxu0 %v2045_v11  ;;  %508 = vmatmul.f32.vlgmr.msra.gmra.mxu1 %v2045_v11 }
 0x19d   :  { %528 = vmatmul.f32.vlgmr.msra.gmra.mxu2 %v2045_v11  ;;  %726 = vmatpush.msra.mxu0 %v1454_v10  ;;  %v2692_v10 = vld [vmem:[#allocation7_spill] sm:$0xff] }
 0x19e   :  { %793 = vmatpush.msra.mxu1 %v1418_v4  ;;  %813 = vmatpush.msra.mxu2 %v1483_v15  ;;  %v2688_v4 = vld [vmem:[#allocation9_spill] sm:$0xff]  ;;  %v2695_v15 = vld [vmem:[#allocation8_spill] sm:$0xff] }
 0x19f   :  { %727 = vmatpush.msra.mxu0 %v1466_v12  ;;  %v2693_v12 = vld [vmem:[#allocation4_spill] sm:$0xff] }
 0x1a0   :  { %794 = vmatpush.msra.mxu1 %v1433_v7  ;;  %814 = vmatpush.msra.mxu2 %v1504_v18  ;;  %v2689_v7 = vld [vmem:[#allocation6_spill] sm:$0xff] }
 0x1a1   :  { %728 = vmatpush.msra.mxu0 %v1488_v16  ;;  %v2696_v16 = vld [vmem:[#allocation5_spill] sm:$0xff]  ;;  %2705 = vst [vmem:[#allocation6_spill] sm:$0xff] %v2366_v60 }
 0x1a2   :  { %795 = vmatpush.msra.mxu1 %v1441_v8  ;;  %815 = vmatpush.msra.mxu2 %v1522_v21  ;;  %v2690_v8 = vld [vmem:[#allocation3_spill] sm:$0xff]  ;;  %v2699_v21 = vld [vmem:[#allocation28_spill] sm:$0xff] }
 0x1a3   :  { %729 = vmatpush.msra.mxu0 %v1509_v19 }
 0x1a4   :  { %796 = vmatpush.msra.mxu1 %v1449_v9  ;;  %816 = vmatpush.msra.mxu2 %v1547_v25  ;;  %v2691_v9 = vld [vmem:[#allocation10_spill] sm:$0xff] }
 0x1a5   :  { %730 = vmatpush.msra.mxu0 %v1527_v22 }
 0x1a6   :  { %797 = vmatpush.msra.mxu1 %v1471_v13  ;;  %817 = vmatpush.msra.mxu2 %v1581_v30  ;;  %v2694_v13 = vld [vmem:[#allocation11_spill] sm:$0xff] }
 0x1a7   :  { %731 = vmatpush.msra.mxu0 %v1563_v28 }
 0x1a8   :  { %798 = vmatpush.msra.mxu1 %v1495_v17  ;;  %818 = vmatpush.msra.mxu2 %v1599_v33  ;;  %v2697_v17 = vld [vmem:[#allocation12_spill] sm:$0xff] }
 0x1a9   :  { %732 = vmatpush.msra.mxu0 %v1586_v31 }
 0x1aa   :  { %799 = vmatpush.msra.mxu1 %v1514_v20  ;;  %819 = vmatpush.msra.mxu2 %v1624_v37  ;;  %v2698_v20 = vld [vmem:[#allocation25_spill] sm:$0xff] }
 0x1ab   :  { %733 = vmatpush.msra.mxu0 %v1604_v34  ;;  %v143_v22 = vadd.f32 %v2699_v21, %v2698_v20  ;;  %v2157_v21 = vld [vmem:[%s2605_s3 + $0x138] sm:$0xff] }
 0x1ac   :  { %800 = vmatpush.msra.mxu1 %v1534_v23  ;;  %820 = vmatpush.msra.mxu2 %v1663_v43  ;;  %v2700_v23 = vld [vmem:[#allocation21_spill] sm:$0xff] }
 0x1ad   :  { %734 = vmatpush.msra.mxu0 %v1629_v38 }
 0x1ae   :  { %801 = vmatpush.msra.mxu1 %v1552_v26  ;;  %821 = vmatpush.msra.mxu2 %v1681_v46  ;;  %v2701_v26 = vld [vmem:[#allocation26_spill] sm:$0xff] }
 0x1af   :  { %735 = vmatpush.msra.mxu0 %v1647_v41 }
 0x1b0   :  { %802 = vmatpush.msra.mxu1 %v1572_v29  ;;  %822 = vmatpush.msra.mxu2 %v1701_v49  ;;  %v2702_v29 = vld [vmem:[#allocation16_spill] sm:$0xff] }
 0x1b1   :  { %736 = vmatpush.msra.mxu0 %v1668_v44 }
 0x1b2   :  { %803 = vmatpush.msra.mxu1 %v1591_v32  ;;  %823 = vmatpush.msra.mxu2 %v1736_v56 }
 0x1b3   :  { %737 = vmatpush.msra.mxu0 %v1686_v47 }
 0x1b4   :  { %804 = vmatpush.msra.mxu1 %v1611_v35  ;;  %824 = vmatpush.msra.mxu2 %v1753_v58 }
 0x1b5   :  { %738 = vmatpush.msra.mxu0 %v1706_v50 }
 0x1b6   :  { %805 = vmatpush.msra.mxu1 %v1634_v39  ;;  %825 = vmatpush.msra.mxu2 %v2688_v4 }
 0x1b7   :  { %739 = vmatpush.msra.mxu0 %v2689_v7 }
 0x1b8   :  { %806 = vmatpush.msra.mxu1 %v2690_v8  ;;  %826 = vmatpush.msra.mxu2 %v2691_v9  ;;  %v2115_v8 = vld [vmem:[%s2605_s3 + $0x178] sm:$0xff] }
 0x1b9   :  { %740 = vmatpush.msra.mxu0 %v2692_v10  ;;  %v2121_v10 = vld [vmem:[%s2605_s3 + $0x168] sm:$0xff] }
 0x1ba   :  { %807 = vmatpush.msra.mxu1 %v2693_v12  ;;  %827 = vmatpush.msra.mxu2 %v2694_v13  ;;  %v2127_v12 = vld [vmem:[%s2605_s3 + $0x170] sm:$0xff] }
 0x1bb   :  { %741 = vmatpush.msra.mxu0 %v2695_v15  ;;  %v2133_v15 = vld [vmem:[%s2605_s3 + $0x160] sm:$0xff] }
 0x1bc   :  { %808 = vmatpush.msra.mxu1 %v2696_v16  ;;  %828 = vmatpush.msra.mxu2 %v2697_v17  ;;  %v2139_v16 = vld [vmem:[%s2605_s3 + $0x150] sm:$0xff] }
 0x219   :  { %v489_v18 = vpop.f32.mrf.mxu0  ;;  %v509_v19 = vpop.f32.mrf.mxu1 }
 0x21a   :  { %v490_v25 = vadd.f32 %v489_v18, %v2700_v23  ;;  %v510_v28 = vadd.f32 %v509_v19, %v2701_v26  ;;  %v2145_v18 = vld [vmem:[%s2605_s3 + $0x158] sm:$0xff]  ;;  %v2151_v19 = vld [vmem:[%s2605_s3 + $0x148] sm:$0xff] }
 0x21c   :  { %v532_v30 = vadd.f32 %v490_v25, %v2702_v29  ;;  %v552_v31 = vadd.f32 %v510_v28, %v143_v22  ;;  %v2163_v22 = vld [vmem:[%s2605_s3 + $0x140] sm:$0xff]  ;;  %v2169_v25 = vld [vmem:[%s2605_s3 + $0x130] sm:$0xff]  ;;  %v2181_v29 = vld [vmem:[%s2605_s3 + $0x128] sm:$0xff] }
 0x21d   :  { %v2175_v28 = vld [vmem:[%s2605_s3 + $0x120] sm:$0xff] }
 0x21e   :  { %v1216_v32 = vmul.f32 -1.442695, %v532_v30  ;;  %v1217_v33 = vmul.f32 -1.442695, %v552_v31  ;;  %v2187_v30 = vld [vmem:[%s2605_s3 + $0x118] sm:$0xff]  ;;  %v2193_v31 = vld [vmem:[%s2605_s3 + $0x108] sm:$0xff] }
 0x220   :  { %1252 = vpow2.f32 %v1216_v32  ;;  %v529_v59 = vpop.f32.mrf.mxu2  ;;  %v2199_v32 = vld [vmem:[%s2605_s3 + $0x110] sm:$0xff] }
 0x221   :  { %1254 = vpow2.f32 %v1217_v33  ;;  %v530_v40 = vadd.f32 %v529_v59, %v1963_v2  ;;  %v2205_v33 = vld [vmem:[%s2605_s3 + $0x100] sm:$0xff]  ;;  %v2295_v59 = vld [vmem:[%s2605_s3 + $0x88] sm:$0xff] }
 0x226   :  { %v1253_v34 = vpop.eup %1252 }
 0x227   :  { %v1255_v35 = vpop.eup %1254  ;;  %v536_v37 = vadd.f32 1.0, %v1253_v34  ;;  %v2211_v34 = vld [vmem:[%s2605_s3 + $0xf0] sm:$0xff] }
 0x228   :  { %v556_v38 = vadd.f32 1.0, %v1255_v35  ;;  %v2217_v35 = vld [vmem:[%s2605_s3 + $0xf8] sm:$0xff] }
 0x229   :  { %1256 = vrcp.f32 %v536_v37  ;;  %v548_v47 = vand.u32 2147483648, %v536_v37  ;;  %v546_v50 = vand.u32 2147483647, %v536_v37  ;;  %vm542_vm2 = vweird.f32 %v536_v37 }
 0x22a   :  { %1258 = vrcp.f32 %v556_v38  ;;  %v568_v45 = vand.u32 2147483648, %v556_v38  ;;  %vm562_vm6 = vweird.f32 %v556_v38  ;;  %v566_v52 = vand.u32 2147483647, %v556_v38 }
 0x22b   :  { %v549_v3 = vor.u32 1.1754944e-38, %v548_v47  ;;  %vm547_vm4 = vcmp.eq.f32.partialorder %v546_v50, 8.507059e+37  ;;  %v2271_v47 = vld [vmem:[%s2605_s3 + $0xb0] sm:$0xff] }
 0x22c   :  { %v569_v27 = vor.u32 1.1754944e-38, %v568_v45  ;;  %vm567_vm8 = vcmp.eq.f32.partialorder %v566_v52, 8.507059e+37  ;;  %v2283_v50 = vld [vmem:[%s2605_s3 + $0x90] sm:$0xff] }
 0x22d   :  { %v2706_v45 = vld [vmem:[#allocation29_spill] sm:$0xff] }
 0x22f   :  { %v1257_v39 = vpop.eup %1256 }
 0x230   :  { %v1259_v41 = vpop.eup %1258  ;;  %v538_v42 = vmul.f32 %v1257_v39, %v536_v37  ;;  %vm543_vm1 = vweird.f32 %v1257_v39  ;;  %v2223_v37 = vld [vmem:[%s2605_s3 + $0xe8] sm:$0xff] }
 0x231   :  { %v558_v43 = vmul.f32 %v1259_v41, %v556_v38  ;;  %vm544_vm3 = vmor %vm542_vm2, %vm543_vm1  ;;  %vm563_vm5 = vweird.f32 %v1259_v41  ;;  %v2229_v38 = vld [vmem:[%s2605_s3 + $0xd8] sm:$0xff] }
 0x232   :  { %v539_v44 = vsub.f32 1.0, %v538_v42  ;;  %vm564_vm7 = vmor %vm562_vm6, %vm563_vm5  ;;  %v2247_v42 = vld [vmem:[%s2605_s3 + $0xc0] sm:$0xff] }
 0x233   :  { %v559_v46 = vsub.f32 1.0, %v558_v43  ;;  %v2253_v43 = vld [vmem:[%s2605_s3 + $0xc8] sm:$0xff] }
 0x234   :  { %v540_v49 = vmul.f32 %v1257_v39, %v539_v44  ;;  %v2259_v44 = vld [vmem:[%s2605_s3 + $0xb8] sm:$0xff] }
 0x235   :  { %v560_v51 = vmul.f32 %v1259_v41, %v559_v46  ;;  %v2265_v46 = vld [vmem:[%s2605_s3 + $0xa8] sm:$0xff] }
 0x236   :  { %v541_v5 = vadd.f32 %v1257_v39, %v540_v49  ;;  %v2277_v49 = vld [vmem:[%s2605_s3 + $0xa0] sm:$0xff] }
 0x237   :  { %v561_v14 = vadd.f32 %v1259_v41, %v560_v51  ;;  %v2289_v51 = vld [vmem:[%s2605_s3 + $0x98] sm:$0xff] }
 0x238   :  { %v545_v48 = vsel %vm544_vm3, %v1257_v39, %v541_v5  ;;  %v2235_v39 = vld [vmem:[%s2605_s3 + $0xe0] sm:$0xff]  ;;  %v2301_v5 = vld [vmem:[%s2605_s3 + $0x78] sm:$0xff] }
 0x239   :  { %v550_v6 = vsel %vm547_vm4, %v549_v3, %v545_v48  ;;  %v565_v61 = vsel %vm564_vm7, %v1259_v41, %v561_v14  ;;  %v2241_v41 = vld [vmem:[%s2605_s3 + $0xd0] sm:$0xff]  ;;  %v2327_v48 = vld [vmem:[%s2605_s3 + $0x48] sm:$0xff]  ;;  %v2353_v14 = vld [vmem:[%s2605_s3 + $0x18] sm:$0xff] }
 0x23a   :  { %v572_v0 = vmul.f32 %v550_v6, %v530_v40  ;;  %v570_v24 = vsel %vm567_vm8, %v569_v27, %v565_v61  ;;  %v2308_v3 = vld [vmem:[%s2605_s3 + $0x70] sm:$0xff]  ;;  %v2314_v40 = vld [vmem:[%s2605_s3 + $0x60] sm:$0xff] }
 0x23b   :  { %v575_v54 = vsub.f32 1.0, %v570_v24  ;;  %v577_v55 = vmul.f32 %v570_v24, %v2045_v11  ;;  %v2340_v6 = vld [vmem:[%s2605_s3 + $0x30] sm:$0xff]  ;;  %v2707_v24 = vld [vmem:[#allocation18_spill] sm:$0xff] }
 0x23c   :  { %v573_v57 = vadd.f32 %v572_v0, %v184_v62 }
 0x23e   :  { %1260 = vtanh.f32 %v573_v57 }
 0x244   :  { %v1261_v53 = vpop.eup %1260 }
 0x245   :  { %v576_v63 = vmul.f32 %v1261_v53, %v575_v54 }
 0x247   :  { %v2107_v7 = vadd.f32 %v577_v55, %v576_v63 }
 0x249   :  { %595 = vmatmul.f32.vlgmr.msra.gmra.mxu3 %v2107_v7  ;;  %615 = vmatmul.f32.vlgmr.msrb.gmra.mxu0 %v2107_v7 }
 0x24a   :  { %635 = vmatmul.f32.vlgmr.msrb.gmra.mxu1 %v2107_v7  ;;  %833 = vmatpush.msra.mxu3 %v2115_v8 }
 0x24b   :  { %900 = vmatpush.msrb.mxu0 %v2121_v10  ;;  %920 = vmatpush.msrb.mxu1 %v2127_v12 }
 0x24c   :  { %834 = vmatpush.msra.mxu3 %v2133_v15 }
 0x24d   :  { %901 = vmatpush.msrb.mxu0 %v2139_v16  ;;  %921 = vmatpush.msrb.mxu1 %v2145_v18 }
 0x24e   :  { %835 = vmatpush.msra.mxu3 %v2151_v19 }
 0x24f   :  { %902 = vmatpush.msrb.mxu0 %v2157_v21  ;;  %922 = vmatpush.msrb.mxu1 %v2163_v22 }
 0x250   :  { %836 = vmatpush.msra.mxu3 %v2169_v25 }
 0x251   :  { %903 = vmatpush.msrb.mxu0 %v2175_v28  ;;  %923 = vmatpush.msrb.mxu1 %v2181_v29 }
 0x252   :  { %837 = vmatpush.msra.mxu3 %v2187_v30 }
 0x253   :  { %904 = vmatpush.msrb.mxu0 %v2193_v31  ;;  %924 = vmatpush.msrb.mxu1 %v2199_v32 }
 0x254   :  { %838 = vmatpush.msra.mxu3 %v2205_v33 }
 0x255   :  { %905 = vmatpush.msrb.mxu0 %v2211_v34  ;;  %925 = vmatpush.msrb.mxu1 %v2217_v35 }
 0x256   :  { %839 = vmatpush.msra.mxu3 %v2223_v37 }
 0x257   :  { %906 = vmatpush.msrb.mxu0 %v2229_v38  ;;  %926 = vmatpush.msrb.mxu1 %v2235_v39 }
 0x258   :  { %840 = vmatpush.msra.mxu3 %v2241_v41 }
 0x259   :  { %907 = vmatpush.msrb.mxu0 %v2247_v42  ;;  %927 = vmatpush.msrb.mxu1 %v2253_v43 }
 0x25a   :  { %841 = vmatpush.msra.mxu3 %v2259_v44 }
 0x25b   :  { %908 = vmatpush.msrb.mxu0 %v2265_v46  ;;  %928 = vmatpush.msrb.mxu1 %v2271_v47 }
 0x25c   :  { %842 = vmatpush.msra.mxu3 %v2277_v49 }
 0x25d   :  { %909 = vmatpush.msrb.mxu0 %v2283_v50  ;;  %929 = vmatpush.msrb.mxu1 %v2289_v51 }
 0x25e   :  { %843 = vmatpush.msra.mxu3 %v2295_v59 }
 0x25f   :  { %910 = vmatpush.msrb.mxu0 %v2301_v5  ;;  %930 = vmatpush.msrb.mxu1 %v1736_v56  ;;  %v2321_v56 = vld [vmem:[%s2605_s3 + $0x58] sm:$0xff] }
 0x260   :  { %844 = vmatpush.msra.mxu3 %v2308_v3 }
 0x261   :  { %911 = vmatpush.msrb.mxu0 %v2314_v40  ;;  %931 = vmatpush.msrb.mxu1 %v1753_v58  ;;  %v2334_v58 = vld [vmem:[%s2605_s3 + $0x40] sm:$0xff] }
 0x262   :  { %845 = vmatpush.msra.mxu3 %v2321_v56 }
 0x263   :  { %912 = vmatpush.msrb.mxu0 %v2327_v48  ;;  %932 = vmatpush.msrb.mxu1 %v2688_v4  ;;  %v2347_v4 = vld [vmem:[%s2605_s3 + $0x28] sm:$0xff] }
 0x264   :  { %846 = vmatpush.msra.mxu3 %v2334_v58 }
 0x265   :  { %913 = vmatpush.msrb.mxu0 %v2340_v6  ;;  %933 = vmatpush.msrb.mxu1 %v2691_v9  ;;  %v2360_v9 = vld [vmem:[%s2605_s3 + $0x10] sm:$0xff] }
 0x266   :  { %847 = vmatpush.msra.mxu3 %v2347_v4  ;;  %2704 = vst [vmem:[#allocation9_spill] sm:$0xff] %v2360_v9 }
 0x267   :  { %914 = vmatpush.msrb.mxu0 %v2353_v14  ;;  %934 = vmatpush.msrb.mxu1 %v2694_v13  ;;  %v146_v13 = vadd.f32 %v2706_v45, %v2698_v20 }
 0x268   :  { %848 = vmatpush.msra.mxu3 %v2360_v9 }
 0x269   :  { %915 = vmatpush.msrb.mxu0 %v2366_v60  ;;  %935 = vmatpush.msrb.mxu1 %v2697_v17 }
 0x2c6   :  { %v616_v62 = vpop.f32.mrf.mxu0 }
 0x2c7   :  { %v617_v0 = vadd.f32 %v616_v62, %v2701_v26 }
 0x2c9   :  { %v659_v52 = vadd.f32 %v617_v0, %v146_v13 }
 0x2cb   :  { %v1219_v57 = vmul.f32 -1.442695, %v659_v52 }
 0x2cc   :  { %v596_v61 = vpop.f32.mrf.mxu3 }
 0x2cd   :  { %1262 = vpow2.f32 %v1219_v57  ;;  %v597_v27 = vadd.f32 %v596_v61, %v2700_v23 }
 0x2cf   :  { %v639_v54 = vadd.f32 %v597_v27, %v2707_v24  ;;  %v636_v27 = vpop.f32.mrf.mxu1 }
 0x2d1   :  { %v1218_v53 = vmul.f32 -1.442695, %v639_v54 }
 0x2d3   :  { %v1263_v63 = vpop.eup %1262  ;;  %1264 = vpow2.f32 %v1218_v53  ;;  %v637_v53 = vadd.f32 %v636_v27, %v1963_v2 }
 0x2d4   :  { %v663_v55 = vadd.f32 1.0, %v1263_v63 }
 0x2d6   :  { %1266 = vrcp.f32 %v663_v55  ;;  %v675_v60 = vand.u32 2147483648, %v663_v55  ;;  %vm669_vm14 = vweird.f32 %v663_v55  ;;  %v673_v9 = vand.u32 2147483647, %v663_v55 }
 0x2d8   :  { %vm674_vm0 = vcmp.eq.f32.partialorder %v673_v9, 8.507059e+37 }
 0x2d9   :  { %v1265_v17 = vpop.eup %1264 }
 0x2da   :  { %v643_v11 = vadd.f32 1.0, %v1265_v17 }
 0x2dc   :  { %1268 = vrcp.f32 %v643_v11  ;;  %v1267_v1 = vpop.eup %1266  ;;  %v655_v52 = vand.u32 2147483648, %v643_v11  ;;  %v653_v61 = vand.u32 2147483647, %v643_v11  ;;  %vm649_vm10 = vweird.f32 %v643_v11 }
 0x2dd   :  { %v665_v45 = vmul.f32 %v1267_v1, %v663_v55  ;;  %vm670_vm13 = vweird.f32 %v1267_v1 }
 0x2de   :  { %v656_v54 = vor.u32 1.1754944e-38, %v655_v52  ;;  %vm654_vm12 = vcmp.eq.f32.partialorder %v653_v61, 8.507059e+37  ;;  %vm671_vm15 = vmor %vm669_vm14, %vm670_vm13 }
 0x2df   :  { %v666_v13 = vsub.f32 1.0, %v665_v45  ;;  %v2708_v45 = vld [vmem:[#allocation35_spill] sm:$0xff] }
 0x2e1   :  { %v667_v26 = vmul.f32 %v1267_v1, %v666_v13 }
 0x2e2   :  { %v1269_v20 = vpop.eup %1268 }
 0x2e3   :  { %v645_v62 = vmul.f32 %v1269_v20, %v643_v11  ;;  %vm650_vm9 = vweird.f32 %v1269_v20  ;;  %v668_v23 = vadd.f32 %v1267_v1, %v667_v26  ;;  %v676_v11 = vor.u32 1.1754944e-38, %v675_v60 }
 0x2e4   :  { %vm651_vm11 = vmor %vm649_vm10, %vm650_vm9 }
 0x2e5   :  { %v646_v0 = vsub.f32 1.0, %v645_v62  ;;  %v187_v62 = vadd.f32 %v2708_v45, %v1966_v36 }
 0x2e7   :  { %v647_v57 = vmul.f32 %v1269_v20, %v646_v0 }
 0x2e9   :  { %v648_v24 = vadd.f32 %v1269_v20, %v647_v57  ;;  %v672_v57 = vsel %vm671_vm15, %v1267_v1, %v668_v23  ;;  %v1354_v1 = vld [vmem:[%s2605_s3 + $0x80] sm:$0xff]  ;;  %v1355_v23 = vld [vmem:[%s2605_s3 + $0x68] sm:$0xff] }
 0x2ea   :  { %v677_v52 = vsel %vm674_vm0, %v676_v11, %v672_v57 }
 0x2eb   :  { %v652_v63 = vsel %vm651_vm11, %v1269_v20, %v648_v24  ;;  %v682_v27 = vsub.f32 1.0, %v677_v52  ;;  %v684_v24 = vmul.f32 %v677_v52, %v2107_v7 }
 0x2ec   :  { %v657_v17 = vsel %vm654_vm12, %v656_v54, %v652_v63 }
 0x2ed   :  { %v679_v0 = vmul.f32 %v657_v17, %v637_v53 }
 0x2ef   :  { %v680_v13 = vadd.f32 %v679_v0, %v187_v62 }
 0x2f1   :  { %1270 = vtanh.f32 %v680_v13 }
 0x2f7   :  { %v1271_v20 = vpop.eup %1270 }
 0x2f8   :  { %v683_v61 = vmul.f32 %v1271_v20, %v682_v27 }
 0x2fa   :  { %v2379_v26 = vadd.f32 %v684_v24, %v683_v61  ;;  %v2716_v61 = vld [vmem:[#allocation13_spill] sm:$0xff] }
 0x2fb   :  { %v190_v24 = vadd.f32 %v2716_v61, %v1966_v36 }
 0x2fc   :  { %702 = vmatmul.f32.vlgmr.msrb.gmra.mxu2 %v2379_v26  ;;  %722 = vmatmul.f32.vlgmr.msrb.gmra.mxu3 %v2379_v26 }
 0x2fd   :  { %742 = vmatmul.f32.vlgmr.msra.gmra.mxu0 %v2379_v26  ;;  %940 = vmatpush.msrb.mxu2 %v2115_v8 }
 0x2fe   :  { %1007 = vmatpush.msrb.mxu3 %v2121_v10  ;;  %1027 = vmatpush.msra.mxu0 %v2127_v12  ;;  %v1356_v10 = vld [vmem:[%s2605_s3 + $0x50] sm:$0xff]  ;;  %v1357_v12 = vld [vmem:[%s2605_s3 + $0x38] sm:$0xff] }
 0x2ff   :  { %941 = vmatpush.msrb.mxu2 %v2133_v15 }
 0x300   :  { %1008 = vmatpush.msrb.mxu3 %v2139_v16  ;;  %1028 = vmatpush.msra.mxu0 %v2145_v18  ;;  %v1358_v16 = vld [vmem:[%s2605_s3 + $0x20] sm:$0xff]  ;;  %v2709_v18 = vld [vmem:[#allocation9_spill] sm:$0xff] }
 0x301   :  { %942 = vmatpush.msrb.mxu2 %v2151_v19 }
 0x302   :  { %1009 = vmatpush.msrb.mxu3 %v2157_v21  ;;  %1029 = vmatpush.msra.mxu0 %v2163_v22  ;;  %v2710_v21 = vld [vmem:[#allocation6_spill] sm:$0xff]  ;;  %v1359_v22 = vld [vmem:[%s2605_s3 + $0x8] sm:$0xff] }
 0x303   :  { %943 = vmatpush.msrb.mxu2 %v2169_v25 }
 0x304   :  { %1010 = vmatpush.msrb.mxu3 %v2175_v28  ;;  %1030 = vmatpush.msra.mxu0 %v2181_v29 }
 0x305   :  { %944 = vmatpush.msrb.mxu2 %v2187_v30 }
 0x306   :  { %1011 = vmatpush.msrb.mxu3 %v2193_v31  ;;  %1031 = vmatpush.msra.mxu0 %v2199_v32  ;;  %v2711_v31 = vld [vmem:[#allocation25_spill] sm:$0xff]  ;;  %v2712_v32 = vld [vmem:[#allocation30_spill] sm:$0xff] }
 0x307   :  { %945 = vmatpush.msrb.mxu2 %v2205_v33 }
 0x308   :  { %1012 = vmatpush.msrb.mxu3 %v2211_v34  ;;  %1032 = vmatpush.msra.mxu0 %v2217_v35  ;;  %v149_v34 = vadd.f32 %v2712_v32, %v2711_v31  ;;  %v2713_v35 = vld [vmem:[#allocation21_spill] sm:$0xff] }
 0x309   :  { %946 = vmatpush.msrb.mxu2 %v2223_v37 }
 0x30a   :  { %1013 = vmatpush.msrb.mxu3 %v2229_v38  ;;  %1033 = vmatpush.msra.mxu0 %v2235_v39  ;;  %v2714_v39 = vld [vmem:[#allocation26_spill] sm:$0xff] }
 0x30b   :  { %947 = vmatpush.msrb.mxu2 %v2241_v41 }
 0x30c   :  { %1014 = vmatpush.msrb.mxu3 %v2247_v42  ;;  %1034 = vmatpush.msra.mxu0 %v2253_v43  ;;  %v2715_v43 = vld [vmem:[#allocation20_spill] sm:$0xff] }
 0x30d   :  { %948 = vmatpush.msrb.mxu2 %v2259_v44 }
 0x30e   :  { %1015 = vmatpush.msrb.mxu3 %v2265_v46  ;;  %1035 = vmatpush.msra.mxu0 %v2271_v47 }
 0x30f   :  { %949 = vmatpush.msrb.mxu2 %v2277_v49 }
 0x310   :  { %1016 = vmatpush.msrb.mxu3 %v2283_v50  ;;  %1036 = vmatpush.msra.mxu0 %v2289_v51 }
 0x311   :  { %950 = vmatpush.msrb.mxu2 %v2295_v59 }
 0x312   :  { %1017 = vmatpush.msrb.mxu3 %v2301_v5  ;;  %1037 = vmatpush.msra.mxu0 %v1354_v1 }
 0x313   :  { %951 = vmatpush.msrb.mxu2 %v2308_v3 }
 0x314   :  { %1018 = vmatpush.msrb.mxu3 %v2314_v40  ;;  %1038 = vmatpush.msra.mxu0 %v1355_v23 }
 0x315   :  { %952 = vmatpush.msrb.mxu2 %v2321_v56 }
 0x316   :  { %1019 = vmatpush.msrb.mxu3 %v2327_v48  ;;  %1039 = vmatpush.msra.mxu0 %v1356_v10 }
 0x317   :  { %953 = vmatpush.msrb.mxu2 %v2334_v58 }
 0x318   :  { %1020 = vmatpush.msrb.mxu3 %v2340_v6  ;;  %1040 = vmatpush.msra.mxu0 %v1357_v12 }
 0x319   :  { %954 = vmatpush.msrb.mxu2 %v2347_v4 }
 0x31a   :  { %1021 = vmatpush.msrb.mxu3 %v2353_v14  ;;  %1041 = vmatpush.msra.mxu0 %v1358_v16 }
 0x31b   :  { %955 = vmatpush.msrb.mxu2 %v2709_v18 }
 0x31c   :  { %1022 = vmatpush.msrb.mxu3 %v2710_v21  ;;  %1042 = vmatpush.msra.mxu0 %v1359_v22 }
 0x37a   :  { %v743_v62 = vpop.f32.mrf.mxu0 }
 0x37b   :  { %v744_v11 = vadd.f32 %v743_v62, %v1963_v2 }
 0x37f   :  { %v703_v28 = vpop.f32.mrf.mxu2  ;;  %v723_v29 = vpop.f32.mrf.mxu3 }
 0x380   :  { %v704_v38 = vadd.f32 %v703_v28, %v2713_v35  ;;  %v724_v42 = vadd.f32 %v723_v29, %v2714_v39 }
 0x382   :  { %v746_v46 = vadd.f32 %v704_v38, %v2715_v43  ;;  %v766_v47 = vadd.f32 %v724_v42, %v149_v34  ;;  %v1123_v42 = vld [vmem:[%s2608_s5 + $0x40] sm:$0xff] }
 0x384   :  { %v1220_v50 = vmul.f32 -1.442695, %v746_v46  ;;  %v1221_v51 = vmul.f32 -1.442695, %v766_v47  ;;  %v1122_v46 = vld [vmem:[%s2608_s5 + $0x38] sm:$0xff] }
 0x386   :  { %1272 = vpow2.f32 %v1220_v50  ;;  %v1121_v50 = vld [vmem:[%s2608_s5 + $0x30] sm:$0xff] }
 0x387   :  { %1274 = vpow2.f32 %v1221_v51  ;;  %v1120_v51 = vld [vmem:[%s2608_s5 + $0x28] sm:$0xff] }
 0x38c   :  { %v1273_v5 = vpop.eup %1272 }
 0x38d   :  { %v1275_v40 = vpop.eup %1274  ;;  %v750_v48 = vadd.f32 1.0, %v1273_v5 }
 0x38e   :  { %v770_v6 = vadd.f32 1.0, %v1275_v40  ;;  %v1119_v40 = vld [vmem:[%s2608_s5 + $0x20] sm:$0xff] }
 0x38f   :  { %1276 = vrcp.f32 %v750_v48  ;;  %v762_v53 = vand.u32 2147483648, %v750_v48  ;;  %v760_v45 = vand.u32 2147483647, %v750_v48  ;;  %vm756_vm2 = vweird.f32 %v750_v48 }
 0x390   :  { %1278 = vrcp.f32 %v770_v6  ;;  %v782_v23 = vand.u32 2147483648, %v770_v6  ;;  %vm776_vm6 = vweird.f32 %v770_v6  ;;  %v780_v10 = vand.u32 2147483647, %v770_v6 }
 0x391   :  { %v763_v57 = vor.u32 1.1754944e-38, %v762_v53  ;;  %vm761_vm4 = vcmp.eq.f32.partialorder %v760_v45, 8.507059e+37 }
 0x392   :  { %v783_v21 = vor.u32 1.1754944e-38, %v782_v23  ;;  %vm781_vm8 = vcmp.eq.f32.partialorder %v780_v10, 8.507059e+37 }
 0x395   :  { %v1277_v14 = vpop.eup %1276 }
 0x396   :  { %v1279_v9 = vpop.eup %1278  ;;  %v752_v60 = vmul.f32 %v1277_v14, %v750_v48  ;;  %vm757_vm1 = vweird.f32 %v1277_v14 }
 0x397   :  { %v772_v55 = vmul.f32 %v1279_v9, %v770_v6  ;;  %vm758_vm3 = vmor %vm756_vm2, %vm757_vm1  ;;  %vm777_vm5 = vweird.f32 %v1279_v9  ;;  %v1118_v6 = vld [vmem:[%s2608_s5 + $0x18] sm:$0xff] }
 0x398   :  { %v753_v54 = vsub.f32 1.0, %v752_v60  ;;  %vm778_vm7 = vmor %vm776_vm6, %vm777_vm5  ;;  %v1116_v60 = vld [vmem:[%s2608_s5 + $0x8] sm:$0xff] }
 0x399   :  { %v773_v63 = vsub.f32 1.0, %v772_v55 }
 0x39a   :  { %v754_v17 = vmul.f32 %v1277_v14, %v753_v54  ;;  %v1115_v54 = vld [vmem:[%s2608_s5] sm:$0xff] }
 0x39b   :  { %v774_v0 = vmul.f32 %v1279_v9, %v773_v63 }
 0x39c   :  { %v755_v13 = vadd.f32 %v1277_v14, %v754_v17 }
 0x39d   :  { %v775_v20 = vadd.f32 %v1279_v9, %v774_v0 }
 0x39e   :  { %v759_v52 = vsel %vm758_vm3, %v1277_v14, %v755_v13  ;;  %v1117_v14 = vld [vmem:[%s2608_s5 + $0x10] sm:$0xff] }
 0x39f   :  { %v764_v27 = vsel %vm761_vm4, %v763_v57, %v759_v52  ;;  %v779_v16 = vsel %vm778_vm7, %v1279_v9, %v775_v20 }
 0x3a0   :  { %v786_v1 = vmul.f32 %v764_v27, %v744_v11  ;;  %v784_v22 = vsel %vm781_vm8, %v783_v21, %v779_v16 }
 0x3a1   :  { %v789_v28 = vsub.f32 1.0, %v784_v22  ;;  %v791_v34 = vmul.f32 %v784_v22, %v2379_v26 }
 0x3a2   :  { %v787_v12 = vadd.f32 %v786_v1, %v190_v24  ;;  %v2719_v1 = vld [vmem:[#allocation15_spill] sm:$0xff] }
 0x3a3   :  { %v193_v23 = vadd.f32 %v2719_v1, %v1966_v36 }
 0x3a4   :  { %1280 = vtanh.f32 %v787_v12 }
 0x3aa   :  { %v1281_v29 = vpop.eup %1280 }
 0x3ab   :  { %v790_v32 = vmul.f32 %v1281_v29, %v789_v28 }
 0x3ad   :  { %v2453_v38 = vadd.f32 %v791_v34, %v790_v32 }
 0x3af   :  { %809 = vmatmul.f32.vlgmr.msra.gmra.mxu1 %v2453_v38  ;;  %829 = vmatmul.f32.vlgmr.msra.gmra.mxu2 %v2453_v38 }
 0x3b0   :  { %849 = vmatmul.f32.vlgmr.msra.gmra.mxu3 %v2453_v38  ;;  %1047 = vmatpush.msra.mxu1 %v2115_v8  ;;  %v1130_v8 = vld [vmem:[%s2608_s5 + $0x78] sm:$0xff] }
 0x3b1   :  { %1135 = vmatpush.msra.mxu2 %v1130_v8 }
 0x3b2   :  { %1048 = vmatpush.msra.mxu1 %v2133_v15  ;;  %v1129_v15 = vld [vmem:[%s2608_s5 + $0x70] sm:$0xff] }
 0x3b3   :  { %1136 = vmatpush.msra.mxu2 %v1129_v15 }
 0x3b4   :  { %1049 = vmatpush.msra.mxu1 %v2151_v19  ;;  %v1128_v19 = vld [vmem:[%s2608_s5 + $0x68] sm:$0xff] }
 0x3b5   :  { %1137 = vmatpush.msra.mxu2 %v1128_v19 }
 0x3b6   :  { %1050 = vmatpush.msra.mxu1 %v2169_v25  ;;  %v1127_v25 = vld [vmem:[%s2608_s5 + $0x60] sm:$0xff] }
 0x3b7   :  { %1138 = vmatpush.msra.mxu2 %v1127_v25 }
 0x3b8   :  { %1051 = vmatpush.msra.mxu1 %v2187_v30 }
 0x3ba   :  { %1052 = vmatpush.msra.mxu1 %v2205_v33 }
 0x3bc   :  { %1053 = vmatpush.msra.mxu1 %v2223_v37  ;;  %v1126_v37 = vld [vmem:[%s2608_s5 + $0x58] sm:$0xff] }
 0x3bd   :  { %1139 = vmatpush.msra.mxu2 %v1126_v37  ;;  %v2720_v37 = vld [vmem:[#allocation27_spill] sm:$0xff] }
 0x3be   :  { %1054 = vmatpush.msra.mxu1 %v2241_v41  ;;  %v2717_v41 = vld [vmem:[#allocation22_spill] sm:$0xff] }
 0x3c0   :  { %1055 = vmatpush.msra.mxu1 %v2259_v44 }
 0x3c2   :  { %1056 = vmatpush.msra.mxu1 %v2277_v49  ;;  %v1125_v49 = vld [vmem:[%s2608_s5 + $0x50] sm:$0xff] }
 0x3c3   :  { %1140 = vmatpush.msra.mxu2 %v1125_v49 }
 0x3c4   :  { %1057 = vmatpush.msra.mxu1 %v2295_v59 }
 0x3c6   :  { %1058 = vmatpush.msra.mxu1 %v2308_v3  ;;  %v1124_v3 = vld [vmem:[%s2608_s5 + $0x48] sm:$0xff] }
 0x3c7   :  { %1141 = vmatpush.msra.mxu2 %v1124_v3 }
 0x3c8   :  { %1059 = vmatpush.msra.mxu1 %v2321_v56 }
 0x3c9   :  { %1142 = vmatpush.msra.mxu2 %v1123_v42 }
 0x3ca   :  { %1060 = vmatpush.msra.mxu1 %v2334_v58  ;;  %v2718_v58 = vld [vmem:[#allocation31_spill] sm:$0xff] }
 0x3cb   :  { %1143 = vmatpush.msra.mxu2 %v1122_v46 }
 0x3cc   :  { %1061 = vmatpush.msra.mxu1 %v2347_v4  ;;  %v152_v4 = vadd.f32 %v2718_v58, %v2711_v31 }
 0x3cd   :  { %1144 = vmatpush.msra.mxu2 %v1121_v50  ;;  %v2550_v50 = vld [vmem:[%s2609_s6] ss:$0 sm:$0xff] }
 0x3ce   :  { %1062 = vmatpush.msra.mxu1 %v2709_v18 }
 0x3cf   :  { %1145 = vmatpush.msra.mxu2 %v1120_v51 }
 0x3d1   :  { %1146 = vmatpush.msra.mxu2 %v1119_v40 }
 0x3d3   :  { %1147 = vmatpush.msra.mxu2 %v1118_v6 }
 0x3d5   :  { %1148 = vmatpush.msra.mxu2 %v1117_v14 }
 0x3d7   :  { %1149 = vmatpush.msra.mxu2 %v1116_v60 }
 0x3d9   :  { %1150 = vmatpush.msra.mxu2 %v1115_v54 }
 0x42c   :  { %v810_v30 = vpop.f32.mrf.mxu1 }
 0x42d   :  { %v811_v33 = vadd.f32 %v810_v30, %v2713_v35 }
 0x42f   :  { %v853_v44 = vadd.f32 %v811_v33, %v2717_v41  ;;  %v2721_v41 = vld [vmem:[#allocation14_spill] sm:$0xff] }
 0x431   :  { %v1222_v59 = vmul.f32 -1.442695, %v853_v44 }
 0x432   :  { %v830_v56 = vpop.f32.mrf.mxu2 }
 0x433   :  { %1282 = vpow2.f32 %v1222_v59  ;;  %v831_v18 = vadd.f32 %v830_v56, %v2714_v39  ;;  %v850_v57 = vpop.f32.mrf.mxu3  ;;  %v2722_v59 = vld [vmem:[#allocation32_spill] sm:$0xff] }
 0x434   :  { %v851_v61 = vadd.f32 %v850_v57, %v1963_v2  ;;  %v155_v3 = vadd.f32 %v2722_v59, %v2711_v31 }
 0x435   :  { %v873_v43 = vadd.f32 %v831_v18, %v152_v4  ;;  %v2723_v4 = vld [vmem:[#allocation23_spill] sm:$0xff] }
 0x437   :  { %v1223_v47 = vmul.f32 -1.442695, %v873_v43 }
 0x439   :  { %v1283_v5 = vpop.eup %1282  ;;  %1284 = vpow2.f32 %v1223_v47 }
 0x43a   :  { %v857_v48 = vadd.f32 1.0, %v1283_v5 }
 0x43c   :  { %1286 = vrcp.f32 %v857_v48  ;;  %v869_v45 = vand.u32 2147483648, %v857_v48  ;;  %v867_v0 = vand.u32 2147483647, %v857_v48  ;;  %vm863_vm10 = vweird.f32 %v857_v48 }
 0x43e   :  { %v870_v27 = vor.u32 1.1754944e-38, %v869_v45  ;;  %vm868_vm12 = vcmp.eq.f32.partialorder %v867_v0, 8.507059e+37 }
 0x43f   :  { %v1285_v9 = vpop.eup %1284 }
 0x440   :  { %v877_v55 = vadd.f32 1.0, %v1285_v9 }
 0x442   :  { %v1287_v53 = vpop.eup %1286  ;;  %1288 = vrcp.f32 %v877_v55  ;;  %v889_v16 = vand.u32 2147483648, %v877_v55  ;;  %v887_v22 = vand.u32 2147483647, %v877_v55  ;;  %vm883_vm14 = vweird.f32 %v877_v55 }
 0x443   :  { %v859_v63 = vmul.f32 %v1287_v53, %v857_v48  ;;  %vm864_vm9 = vweird.f32 %v1287_v53 }
 0x444   :  { %vm865_vm11 = vmor %vm863_vm10, %vm864_vm9  ;;  %v890_v32 = vor.u32 1.1754944e-38, %v889_v16  ;;  %vm888_vm0 = vcmp.eq.f32.partialorder %v887_v22, 8.507059e+37 }
 0x445   :  { %v860_v17 = vsub.f32 1.0, %v859_v63 }
 0x447   :  { %v861_v62 = vmul.f32 %v1287_v53, %v860_v17 }
 0x448   :  { %v1289_v13 = vpop.eup %1288 }
 0x449   :  { %v879_v11 = vmul.f32 %v1289_v13, %v877_v55  ;;  %v862_v52 = vadd.f32 %v1287_v53, %v861_v62  ;;  %vm884_vm13 = vweird.f32 %v1289_v13 }
 0x44a   :  { %vm885_vm15 = vmor %vm883_vm14, %vm884_vm13 }
 0x44b   :  { %v880_v20 = vsub.f32 1.0, %v879_v11  ;;  %v866_v24 = vsel %vm865_vm11, %v1287_v53, %v862_v52 }
 0x44c   :  { %v871_v10 = vsel %vm868_vm12, %v870_v27, %v866_v24  ;;  %v2724_v24 = vld [vmem:[#allocation17_spill] sm:$0xff] }
 0x44d   :  { %v881_v12 = vmul.f32 %v1289_v13, %v880_v20  ;;  %v893_v21 = vmul.f32 %v871_v10, %v851_v61  ;;  %v196_v1 = vadd.f32 %v2724_v24, %v1966_v36 }
 0x44f   :  { %v882_v28 = vadd.f32 %v1289_v13, %v881_v12  ;;  %v894_v29 = vadd.f32 %v893_v21, %v193_v23 }
 0x451   :  { %v886_v34 = vsel %vm885_vm15, %v1289_v13, %v882_v28  ;;  %1290 = vtanh.f32 %v894_v29 }
 0x452   :  { %v891_v8 = vsel %vm888_vm0, %v890_v32, %v886_v34 }
 0x453   :  { %v896_v15 = vsub.f32 1.0, %v891_v8  ;;  %v898_v30 = vmul.f32 %v891_v8, %v2453_v38 }
 0x457   :  { %v1291_v19 = vpop.eup %1290 }
 0x458   :  { %v897_v25 = vmul.f32 %v1291_v19, %v896_v15 }
 0x45a   :  { %v2531_v33 = vadd.f32 %v898_v30, %v897_v25 }
 0x45c   :  { %916 = vmatmul.f32.vlgmr.msrb.gmra.mxu0 %v2531_v33  ;;  %936 = vmatmul.f32.vlgmr.msrb.gmra.mxu1 %v2531_v33 }
 0x45d   :  { %956 = vmatmul.f32.vlgmr.msrb.gmra.mxu2 %v2531_v33 }
 0x465   :  { %1151 = vmatmul.f32.vlgmr.msra.gmra.mxu2 %v2720_v37 }
 0x46d   :  { %1154 = vmatmul.f32.gmra.mxu2 %v2721_v41 }
 0x475   :  { %1157 = vmatmul.f32.gmra.mxu2 %v2107_v7 }
 0x47d   :  { %1160 = vmatmul.f32.gmra.mxu2 %v2379_v26 }
 0x485   :  { %1163 = vmatmul.f32.gmra.mxu2 %v2453_v38 }
 0x48d   :  { %1166 = vmatmul.f32.gmra.mxu2 %v2531_v33 }
 0x4d9   :  { %v917_v44 = vpop.f32.mrf.mxu0  ;;  %v937_v49 = vpop.f32.mrf.mxu1 }
 0x4da   :  { %v918_v56 = vadd.f32 %v917_v44, %v2713_v35  ;;  %v938_v58 = vadd.f32 %v937_v49, %v2714_v39  ;;  %v2725_v49 = vld [vmem:[#allocation34_spill] sm:$0xff] }
 0x4db   :  { %v158_v59 = vadd.f32 %v2725_v49, %v2711_v31 }
 0x4dc   :  { %v960_v18 = vadd.f32 %v918_v56, %v2723_v4  ;;  %v980_v42 = vadd.f32 %v938_v58, %v155_v3 }
 0x4de   :  { %v1224_v43 = vmul.f32 -1.442695, %v960_v18  ;;  %v1225_v7 = vmul.f32 -1.442695, %v980_v42 }
 0x4e0   :  { %1292 = vpow2.f32 %v1224_v43  ;;  %v957_v26 = vpop.f32.mrf.mxu2 }
 0x4e1   :  { %1294 = vpow2.f32 %v1225_v7  ;;  %v958_v57 = vadd.f32 %v957_v26, %v1963_v2  ;;  %v2726_v7 = vld [vmem:[#allocation24_spill] sm:$0xff] }
 0x4e6   :  { %v1293_v38 = vpop.eup %1292 }
 0x4e7   :  { %v1295_v46 = vpop.eup %1294  ;;  %v964_v47 = vadd.f32 1.0, %v1293_v38 }
 0x4e8   :  { %v984_v51 = vadd.f32 1.0, %v1295_v46  ;;  %v1152_v5 = vpop.f32.mrf.mxu2 }
 0x4e9   :  { %1296 = vrcp.f32 %v964_v47  ;;  %v1153_v40 = vadd.f32 %v2550_v50, %v1152_v5  ;;  %v976_v63 = vand.u32 2147483648, %v964_v47  ;;  %v974_v45 = vand.u32 2147483647, %v964_v47 }
 0x4ea   :  { %1298 = vrcp.f32 %v984_v51  ;;  %vm970_vm2 = vweird.f32 %v964_v47  ;;  %v996_v23 = vand.u32 2147483648, %v984_v51  ;;  %vm990_vm6 = vweird.f32 %v984_v51 }
 0x4eb   :  { %1176 = vst [vmem:[%s2610_s7] sm:$0xff] %v1153_v40  ;;  %v977_v13 = vor.u32 1.1754944e-38, %v976_v63  ;;  %vm975_vm4 = vcmp.eq.f32.partialorder %v974_v45, 8.507059e+37  ;;  %v994_v12 = vand.u32 2147483647, %v984_v51 }
 0x4ec   :  { %v997_v22 = vor.u32 1.1754944e-38, %v996_v23 }
 0x4ed   :  { %vm995_vm8 = vcmp.eq.f32.partialorder %v994_v12, 8.507059e+37 }
 0x4ef   :  { %v1297_v48 = vpop.eup %1296 }
 0x4f0   :  { %v1299_v6 = vpop.eup %1298  ;;  %v966_v14 = vmul.f32 %v1297_v48, %v964_v47  ;;  %v1155_v9 = vpop.f32.mrf.mxu2  ;;  %vm971_vm1 = vweird.f32 %v1297_v48 }
 0x4f1   :  { %v986_v60 = vmul.f32 %v1299_v6, %v984_v51  ;;  %v1156_v55 = vadd.f32 %v2550_v50, %v1155_v9  ;;  %vm972_vm3 = vmor %vm970_vm2, %vm971_vm1  ;;  %vm991_vm5 = vweird.f32 %v1299_v6 }
 0x4f2   :  { %v967_v54 = vsub.f32 1.0, %v966_v14  ;;  %vm992_vm7 = vmor %vm990_vm6, %vm991_vm5 }
 0x4f3   :  { %v987_v53 = vsub.f32 1.0, %v986_v60  ;;  %1177 = vst [vmem:[%s2610_s7 + $0x8] sm:$0xff] %v1156_v55 }
 0x4f4   :  { %v968_v17 = vmul.f32 %v1297_v48, %v967_v54 }
 0x4f5   :  { %v988_v62 = vmul.f32 %v1299_v6, %v987_v53 }
 0x4f6   :  { %v969_v0 = vadd.f32 %v1297_v48, %v968_v17 }
 0x4f7   :  { %v989_v20 = vadd.f32 %v1299_v6, %v988_v62 }
 0x4f8   :  { %v973_v11 = vsel %vm972_vm3, %v1297_v48, %v969_v0  ;;  %v1158_v52 = vpop.f32.mrf.mxu2 }
 0x4f9   :  { %v978_v27 = vsel %vm975_vm4, %v977_v13, %v973_v11  ;;  %v1159_v61 = vadd.f32 %v2550_v50, %v1158_v52  ;;  %v993_v21 = vsel %vm992_vm7, %v1299_v6, %v989_v20  ;;  %v2727_v13 = vld [vmem:[#allocation19_spill] sm:$0xff] }
 0x4fa   :  { %v1000_v10 = vmul.f32 %v978_v27, %v958_v57  ;;  %v998_v28 = vsel %vm995_vm8, %v997_v22, %v993_v21  ;;  %v199_v57 = vadd.f32 %v2727_v13, %v1966_v36 }
 0x4fb   :  { %1178 = vst [vmem:[%s2610_s7 + $0x10] sm:$0xff] %v1159_v61  ;;  %v1003_v34 = vsub.f32 1.0, %v998_v28  ;;  %v1005_v19 = vmul.f32 %v998_v28, %v2531_v33 }
 0x4fc   :  { %v1001_v16 = vadd.f32 %v1000_v10, %v196_v1 }
 0x4fe   :  { %1300 = vtanh.f32 %v1001_v16 }
 0x500   :  { %v1161_v29 = vpop.f32.mrf.mxu2 }
 0x501   :  { %v1162_v32 = vadd.f32 %v2550_v50, %v1161_v29 }
 0x503   :  { %1179 = vst [vmem:[%s2610_s7 + $0x18] sm:$0xff] %v1162_v32 }
 0x504   :  { %v1301_v8 = vpop.eup %1300 }
 0x505   :  { %v1004_v15 = vmul.f32 %v1301_v8, %v1003_v34 }
 0x507   :  { %v2572_v25 = vadd.f32 %v1005_v19, %v1004_v15 }
 0x508   :  { %v1164_v30 = vpop.f32.mrf.mxu2 }
 0x509   :  { %v1165_v37 = vadd.f32 %v2550_v50, %v1164_v30  ;;  %1023 = vmatmul.f32.vlgmr.msrb.gmra.mxu3 %v2572_v25  ;;  %1043 = vmatmul.f32.vlgmr.msra.gmra.mxu0 %v2572_v25 }
 0x50a   :  { %1063 = vmatmul.f32.vlgmr.msra.gmra.mxu1 %v2572_v25  ;;  %1169 = vmatmul.f32.gmra.mxu2 %v2572_v25 }
 0x50b   :  { %1180 = vst [vmem:[%s2610_s7 + $0x20] sm:$0xff] %v1165_v37 }
 0x510   :  { %v1167_v41 = vpop.f32.mrf.mxu2 }
 0x511   :  { %v1168_v33 = vadd.f32 %v2550_v50, %v1167_v41 }
 0x513   :  { %1181 = vst [vmem:[%s2610_s7 + $0x28] sm:$0xff] %v1168_v33 }
 0x586   :  { %v1044_v44 = vpop.f32.mrf.mxu0 }
 0x587   :  { %v1045_v3 = vadd.f32 %v1044_v44, %v2714_v39  ;;  %v1064_v55 = vpop.f32.mrf.mxu1 }
 0x588   :  { %v1065_v17 = vadd.f32 %v1064_v55, %v1963_v2 }
 0x589   :  { %v1087_v56 = vadd.f32 %v1045_v3, %v158_v59 }
 0x58b   :  { %v1227_v58 = vmul.f32 -1.442695, %v1087_v56 }
 0x58c   :  { %v1024_v4 = vpop.f32.mrf.mxu3 }
 0x58d   :  { %1302 = vpow2.f32 %v1227_v58  ;;  %v1025_v18 = vadd.f32 %v1024_v4, %v2713_v35  ;;  %v1170_v42 = vpop.f32.mrf.mxu2 }
 0x58e   :  { %v1171_v43 = vadd.f32 %v2550_v50, %v1170_v42 }
 0x58f   :  { %v1067_v26 = vadd.f32 %v1025_v18, %v2726_v7 }
 0x590   :  { %1182 = vst [vmem:[%s2610_s7 + $0x30] sm:$0xff] %v1171_v43 }
 0x591   :  { %v1226_v38 = vmul.f32 -1.442695, %v1067_v26 }
 0x593   :  { %v1303_v46 = vpop.eup %1302  ;;  %1304 = vpow2.f32 %v1226_v38 }
 0x594   :  { %v1091_v31 = vadd.f32 1.0, %v1303_v46 }
 0x596   :  { %1306 = vrcp.f32 %v1091_v31  ;;  %v1103_v11 = vand.u32 2147483648, %v1091_v31  ;;  %vm1097_vm14 = vweird.f32 %v1091_v31  ;;  %v1101_v27 = vand.u32 2147483647, %v1091_v31 }
 0x598   :  { %v1104_v24 = vor.u32 1.1754944e-38, %v1103_v11  ;;  %vm1102_vm0 = vcmp.eq.f32.partialorder %v1101_v27, 8.507059e+37 }
 0x599   :  { %v1305_v39 = vpop.eup %1304 }
 0x59a   :  { %v1071_v47 = vadd.f32 1.0, %v1305_v39 }
 0x59c   :  { %1308 = vrcp.f32 %v1071_v47  ;;  %v1307_v51 = vpop.eup %1306  ;;  %v1083_v14 = vand.u32 2147483648, %v1071_v47  ;;  %v1081_v60 = vand.u32 2147483647, %v1071_v47  ;;  %vm1077_vm10 = vweird.f32 %v1071_v47 }
 0x59d   :  { %v1093_v5 = vmul.f32 %v1307_v51, %v1091_v31  ;;  %vm1098_vm13 = vweird.f32 %v1307_v51 }
 0x59e   :  { %v1084_v63 = vor.u32 1.1754944e-38, %v1083_v14  ;;  %vm1082_vm12 = vcmp.eq.f32.partialorder %v1081_v60, 8.507059e+37  ;;  %vm1099_vm15 = vmor %vm1097_vm14, %vm1098_vm13 }
 0x59f   :  { %v1094_v48 = vsub.f32 1.0, %v1093_v5 }
 0x5a1   :  { %v1095_v54 = vmul.f32 %v1307_v51, %v1094_v48 }
 0x5a2   :  { %v1309_v35 = vpop.eup %1308 }
 0x5a3   :  { %v1073_v40 = vmul.f32 %v1309_v35, %v1071_v47  ;;  %vm1078_vm9 = vweird.f32 %v1309_v35  ;;  %v1096_v0 = vadd.f32 %v1307_v51, %v1095_v54 }
 0x5a4   :  { %vm1079_vm11 = vmor %vm1077_vm10, %vm1078_vm9 }
 0x5a5   :  { %v1074_v6 = vsub.f32 1.0, %v1073_v40  ;;  %v1100_v61 = vsel %vm1099_vm15, %v1307_v51, %v1096_v0 }
 0x5a6   :  { %v1105_v1 = vsel %vm1102_vm0, %v1104_v24, %v1100_v61 }
 0x5a7   :  { %v1075_v9 = vmul.f32 %v1309_v35, %v1074_v6  ;;  %v1110_v2 = vsub.f32 1.0, %v1105_v1  ;;  %v1112_v12 = vmul.f32 %v1105_v1, %v2572_v25 }
 0x5a9   :  { %v1076_v53 = vadd.f32 %v1309_v35, %v1075_v9 }
 0x5ab   :  { %v1080_v45 = vsel %vm1079_vm11, %v1309_v35, %v1076_v53 }
 0x5ac   :  { %v1085_v62 = vsel %vm1082_vm12, %v1084_v63, %v1080_v45 }
 0x5ad   :  { %v1107_v52 = vmul.f32 %v1085_v62, %v1065_v17 }
 0x5af   :  { %v1108_v20 = vadd.f32 %v1107_v52, %v199_v57 }
 0x5b1   :  { %1310 = vtanh.f32 %v1108_v20 }
 0x5b7   :  { %v1311_v23 = vpop.eup %1310 }
 0x5b8   :  { %v1111_v10 = vmul.f32 %v1311_v23, %v1110_v2 }
 0x5ba   :  { %v1113_v16 = vadd.f32 %v1112_v12, %v1111_v10 }
 0x5bc   :  { %1172 = vmatmul.f32.gmra.mxu2 %v1113_v16 }
 0x63f   :  { %v1173_v21 = vpop.f32.mrf.mxu2 }
 0x640   :  { %v1174_v36 = vadd.f32 %v2550_v50, %v1173_v21 }
 0x642   :  { %1183 = vst [vmem:[%s2610_s7 + $0x38] sm:$0xff] %v1174_v36 }

</bundles_post_ra>
